<compile_context>
chip_gen: v6e
topology: v6e:2x2x1
jax: 0.10.0
libtpu: 0.0.40
codegen_flags: <defaults>
</compile_context>

<pallas_src>
import functools

import jax
import jax.numpy as jnp
from jax.experimental import pallas as pl
from jax.experimental.pallas import tpu as pltpu

_LANE = 128


def _vmem_budget_bytes():
    """~96 MiB on 128-MiB-VMEM parts (v5e/v6e), 48 MiB on 64-MiB parts (v7x)."""
    try:
        cap = pltpu.get_tpu_info().vmem_capacity_bytes
    except Exception:
        cap = 64 * 1024 * 1024
    return int(min(100 * 1024 * 1024, cap * 3 // 4))


def _lstm_recurrent_kernel(gx_ref, whh_hbm, out_ref, whh_vmem, h_scr, c_scr):
    """One grid step = t_block timesteps of the LSTM recurrence for one batch shard.

    gx_ref  : (T, Bs, 4*Hl) bf16  precomputed x @ W_ih^T + (b_ih + b_hh), gate-padded
    whh_hbm : (Hl, 4*Hl)    bf16  recurrent weight in HBM (memory_space=ANY)
    out_ref : (T, Bs, Hl)   bf16  hidden states for this time block
    whh_vmem: (Hl, 4*Hl)    bf16  single-buffered resident copy of the weight
    h_scr   : (Bs, Hl)      bf16  hidden carry (persistent across time axis)
    c_scr   : (Bs, Hl)      f32   cell carry   (persistent across time axis)
    """
    s = pl.program_id(1)  # time-block index ("arbitrary" => sequential)

    @pl.when(s == 0)
    def _():
        # Copy the grid-invariant weight once per core (single VMEM buffer),
        # and reset the carries at the start of each batch shard.
        pltpu.sync_copy(whh_hbm, whh_vmem)
        h_scr[...] = jnp.zeros_like(h_scr)
        c_scr[...] = jnp.zeros_like(c_scr)

    Hl = h_scr.shape[-1]
    T = gx_ref.shape[0]
    whh = whh_vmem[...]  # hoisted load; resident across the inner loop

    def step(t, carry):
        h, c = carry  # h: bf16, c: f32
        # (Bs, 4*Hl) f32: bf16 gx upcast + bf16 x bf16 MXU matmul with f32 accumulation.
        gates = gx_ref[t].astype(jnp.float32) + jnp.dot(
            h, whh, preferred_element_type=jnp.float32)
        # Lane-aligned gate views (each gate occupies a full 128-multiple block).
        i_g = jax.nn.sigmoid(gates[:, 0 * Hl:1 * Hl])
        f_g = jax.nn.sigmoid(gates[:, 1 * Hl:2 * Hl])
        g_g = jnp.tanh(gates[:, 2 * Hl:3 * Hl])
        o_g = jax.nn.sigmoid(gates[:, 3 * Hl:4 * Hl])
        c_new = f_g * c + i_g * g_g
        h_new = (o_g * jnp.tanh(c_new)).astype(h_scr.dtype)   # single bf16 cast/step
        out_ref[t] = h_new                                     # full-tile, lane-dense store
        return h_new, c_new

    h, c = jax.lax.fori_loop(0, T, step, (h_scr[...], c_scr[...]),
                             unroll=min(8, T))
    h_scr[...] = h
    c_scr[...] = c


def prepare_lstm_params(w_ih, w_hh, b_ih, b_hh):
    """One-time (outside the hot path) transpose + per-gate lane padding + bf16 cast.

    PyTorch layout: w_ih (4H, D), w_hh (4H, H), biases (4H,), gate order i,f,g,o.
    Returns wih_t (D, 4*Hl) bf16, whh_t (Hl, 4*Hl) bf16, bias (4*Hl,) f32,
    where Hl = ceil(H/128)*128 and each gate occupies a 128-aligned column block.
    """
    H4, _ = w_ih.shape
    H = H4 // 4
    Hl = ((H + _LANE - 1) // _LANE) * _LANE

    def pad_gate_cols(w_t):  # (rows, 4H) -> (rows, 4*Hl), zero-filled padding
        rows = w_t.shape[0]
        out = jnp.zeros((rows, 4 * Hl), w_t.dtype)
        for k in range(4):
            out = out.at[:, k * Hl:k * Hl + H].set(w_t[:, k * H:(k + 1) * H])
        return out

    wih_t = pad_gate_cols(jnp.transpose(w_ih)).astype(jnp.bfloat16)      # (D, 4*Hl)
    whh_t = pad_gate_cols(jnp.transpose(w_hh))                           # (H, 4*Hl)
    whh_t = jnp.pad(whh_t, ((0, Hl - H), (0, 0))).astype(jnp.bfloat16)   # (Hl, 4*Hl)
    bias = pad_gate_cols((b_ih + b_hh)[None, :].astype(jnp.float32))[0]  # (4*Hl,)
    return wih_t, whh_t, bias


@functools.partial(jax.jit, static_argnames=("hidden_size", "t_block"))
def lstm_layer_pallas(x, wih_t, whh_t, bias, *, hidden_size, t_block=32):
    """x: (B, S, D) batch-first; returns (B, S, H) like nn.LSTM(batch_first=True)."""
    B, S, D = x.shape
    H = hidden_size
    Hl = whh_t.shape[0]          # lane-padded hidden size (multiple of 128)

    # Block more timesteps per grid step (amortize grid overhead), but never
    # more than the real sequence length.
    t_block = int(max(1, min(t_block, S)))
    S_pad = ((S + t_block - 1) // t_block) * t_block

    # Pad batch to a full sublane group; megacore batch sharding only when each
    # shard keeps >= 8 rows (B_pad >= 16).  At B=2 the parallel axis is size 1.
    B_pad = max(8, ((B + 7) // 8) * 8)
    n_bshards = 2 if B_pad >= 16 and B_pad % 16 == 0 else 1
    Bs = B_pad // n_bshards

    # ---- Hoisted input projection (off the serial critical path) -----------
    # Transpose the SMALL x array to time-major first (instead of transposing
    # the 4H-wide gx afterwards), then one big MXU matmul with bias folded in.
    x_tm = jnp.transpose(x, (1, 0, 2))                              # (S, B, D)
    gx = jnp.dot(x_tm.reshape(S * B, D).astype(jnp.bfloat16), wih_t,
                 preferred_element_type=jnp.float32) + bias         # (S*B, 4*Hl) f32
    gx = gx.astype(jnp.bfloat16).reshape(S, B, 4 * Hl)              # bf16 HBM stream
    gx = jnp.pad(gx, ((0, S_pad - S), (0, B_pad - B), (0, 0)))

    out_tm = pl.pallas_call(
        _lstm_recurrent_kernel,
        out_shape=jax.ShapeDtypeStruct((S_pad, B_pad, Hl), jnp.bfloat16),
        grid_spec=pltpu.PrefetchScalarGridSpec(
            num_scalar_prefetch=0,
            grid=(n_bshards, S_pad // t_block),
            in_specs=[
                pl.BlockSpec((t_block, Bs, 4 * Hl), lambda b, s: (s, b, 0)),
                # Raw HBM ref; copied once into a single-buffered VMEM scratch
                # inside the kernel (avoids Pallas' default double-buffering of
                # the grid-invariant weight -> fits v7x's 64 MiB VMEM at large H).
                pl.BlockSpec(memory_space=pl.ANY),
            ],
            out_specs=pl.BlockSpec((t_block, Bs, Hl), lambda b, s: (s, b, 0)),
            scratch_shapes=[
                pltpu.VMEM((Hl, 4 * Hl), jnp.bfloat16),   # resident W_hh^T
                pltpu.VMEM((Bs, Hl), jnp.bfloat16),       # h carry (bf16)
                pltpu.VMEM((Bs, Hl), jnp.float32),        # c carry (f32)
            ],
        ),
        compiler_params=pltpu.CompilerParams(
            # Batch shards are independent (v7x megacore when B_pad >= 16);
            # the time axis is a true serial recurrence.
            dimension_semantics=("parallel", "arbitrary"),
            vmem_limit_bytes=_vmem_budget_bytes(),
        ),
    )(gx, whh_t)

    # TODO(synk): the remaining (S,B,H)->(B,S,H) transpose (bf16, valid-H slice
    # only) could be folded into out_specs at the cost of per-step
    # sublane-masked stores inside the kernel; kept here to preserve full-tile
    # lane-dense stores on the serial path.
    return out_tm[:S, :B, :H].astype(x.dtype).transpose(1, 0, 2)    # (B, S, H)


def lstm_layer_ref(x, w_ih, w_hh, b_ih, b_hh):
    """Pure-JAX f32 reference matching PyTorch nn.LSTM forward (batch_first)."""
    B, S, D = x.shape
    H = w_hh.shape[1]

    def step(carry, x_t):
        h, c = carry
        gates = x_t @ w_ih.T + b_ih + h @ w_hh.T + b_hh
        i, f, g, o = jnp.split(gates, 4, axis=-1)
        c = jax.nn.sigmoid(f) * c + jax.nn.sigmoid(i) * jnp.tanh(g)
        h = jax.nn.sigmoid(o) * jnp.tanh(c)
        return (h, c), h

    h0 = jnp.zeros((B, H), jnp.float32)
    c0 = jnp.zeros((B, H), jnp.float32)
    _, hs = jax.lax.scan(step, (h0, c0), jnp.transpose(x, (1, 0, 2)))
    return jnp.transpose(hs, (1, 0, 2))


if __name__ == "__main__":
    # Small shapes consistent with the module: batch=2, seq=8, input=16, hidden=32.
    B, S, D, H = 2, 8, 16, 32

    key = jax.random.PRNGKey(0)
    kx, kwi, kwh, kbi, kbh = jax.random.split(key, 5)

    bound = 1.0 / jnp.sqrt(jnp.float32(H))   # PyTorch-style U(-1/sqrt(H), 1/sqrt(H))
    x = jax.random.normal(kx, (B, S, D), jnp.float32)
    w_ih = jax.random.uniform(kwi, (4 * H, D), jnp.float32, -bound, bound)
    w_hh = jax.random.uniform(kwh, (4 * H, H), jnp.float32, -bound, bound)
    b_ih = jax.random.uniform(kbi, (4 * H,), jnp.float32, -bound, bound)
    b_hh = jax.random.uniform(kbh, (4 * H,), jnp.float32, -bound, bound)

    wih_t, whh_t, bias = prepare_lstm_params(w_ih, w_hh, b_ih, b_hh)

    out = lstm_layer_pallas(x, wih_t, whh_t, bias, hidden_size=H)
    out = jax.block_until_ready(out)

    ref = lstm_layer_ref(x, w_ih, w_hh, b_ih, b_hh)
    assert out.shape == (B, S, H)
    # bf16 MXU operands / bf16 gx & h / f32 accumulation => small drift vs f32 ref.
    max_err = jnp.max(jnp.abs(out - ref))
    assert jnp.allclose(out, ref, atol=3e-2, rtol=0.0), (
        f"Pallas LSTM mismatch vs reference (max abs err={max_err})")

    print("KERNEL_OK")
</pallas_src>

<mosaic_0001>
module attributes {stable_mosaic.version = 11 : i64} {
  func.func @_lstm_recurrent_kernel(%arg0: i32, %arg1: i32, %arg2: memref<8x8x512xbf16, #tpu.memory_space<vmem>>, %arg3: memref<128x512xbf16, #tpu.memory_space<any>>, %arg4: memref<8x8x128xbf16, #tpu.memory_space<vmem>>, %arg5: memref<128x512xbf16, #tpu.memory_space<vmem>>, %arg6: memref<8x128xbf16, #tpu.memory_space<vmem>>, %arg7: memref<8x128xf32, #tpu.memory_space<vmem>>) attributes {dimension_semantics = [#tpu.dimension_semantics<parallel>, #tpu.dimension_semantics<arbitrary>], iteration_bounds = array<i64: 1, 1>, scalar_prefetch = 0 : i64, scratch_operands = 3 : i64, tpu.core_type = #tpu.core_type<tc>, window_params = [{transform_indices = @transform_0, window_bounds = array<i64: 8, 8, 512>}, {}, {transform_indices = @transform_2, window_bounds = array<i64: 8, 8, 128>}]} {
    %c0_i32 = arith.constant 0 : i32
    %0 = arith.cmpi eq, %arg1, %c0_i32 : i32
    %1 = arith.extui %0 : i1 to i32
    %c0_i32_0 = arith.constant 0 : i32
    %2 = arith.cmpi ne, %1, %c0_i32_0 : i32
    scf.if %2 {
      "tpu.region"() ({
        %300 = tpu.sem_alloc : memref<!tpu.dma_semaphore, #tpu.memory_space<semaphore_mem>>
        tpu.enqueue_dma source(%arg3 : memref<128x512xbf16, #tpu.memory_space<any>>) target(%arg5 : memref<128x512xbf16, #tpu.memory_space<vmem>>) target_semaphore(%300 : memref<!tpu.dma_semaphore, #tpu.memory_space<semaphore_mem>>)
        tpu.wait_dma2 semaphore(%300 : memref<!tpu.dma_semaphore, #tpu.memory_space<semaphore_mem>>) src(%arg3 : memref<128x512xbf16, #tpu.memory_space<any>>) dst(%arg5 : memref<128x512xbf16, #tpu.memory_space<vmem>>)
        tpu.yield
      }) : () -> ()
      %cst_74 = arith.constant 0.000000e+00 : bf16
      %296 = vector.broadcast %cst_74 : bf16 to vector<8x128xbf16>
      %c0_75 = arith.constant 0 : index
      %c0_76 = arith.constant 0 : index
      %297 = vector.load %arg6[%c0_75, %c0_76] : memref<8x128xbf16, #tpu.memory_space<vmem>>, vector<8x128xbf16>
      tpu.vector_store %arg6[%c0_75, %c0_76], %296 {strides = array<i32>} : memref<8x128xbf16, #tpu.memory_space<vmem>>, vector<8x128xbf16>,
      %cst_77 = arith.constant 0.000000e+00 : f32
      %298 = vector.broadcast %cst_77 : f32 to vector<8x128xf32>
      %c0_78 = arith.constant 0 : index
      %c0_79 = arith.constant 0 : index
      %299 = vector.load %arg7[%c0_78, %c0_79] : memref<8x128xf32, #tpu.memory_space<vmem>>, vector<8x128xf32>
      tpu.vector_store %arg7[%c0_78, %c0_79], %298 {strides = array<i32>} : memref<8x128xf32, #tpu.memory_space<vmem>>, vector<8x128xf32>,
    } else {
    }
    %c0 = arith.constant 0 : index
    %c0_1 = arith.constant 0 : index
    %3 = vector.load %arg5[%c0, %c0_1] : memref<128x512xbf16, #tpu.memory_space<vmem>>, vector<128x512xbf16>
    %c0_2 = arith.constant 0 : index
    %c0_3 = arith.constant 0 : index
    %4 = vector.load %arg6[%c0_2, %c0_3] : memref<8x128xbf16, #tpu.memory_space<vmem>>, vector<8x128xbf16>
    %c0_4 = arith.constant 0 : index
    %c0_5 = arith.constant 0 : index
    %5 = vector.load %arg7[%c0_4, %c0_5] : memref<8x128xf32, #tpu.memory_space<vmem>>, vector<8x128xf32>
    %c0_i32_6 = arith.constant 0 : i32
    %6 = arith.index_cast %c0_i32_6 : i32 to index
    %c0_7 = arith.constant 0 : index
    %c0_8 = arith.constant 0 : index
    %7 = vector.load %arg2[%6, %c0_7, %c0_8] : memref<8x8x512xbf16, #tpu.memory_space<vmem>>, vector<1x8x512xbf16>
    %8 = vector.shape_cast %7 : vector<1x8x512xbf16> to vector<8x512xbf16>
    %9 = arith.extf %8 : vector<8x512xbf16> to vector<8x512xf32>
    %cst = arith.constant dense<0.000000e+00> : vector<8x512xf32>
    %10 = tpu.matmul %4, %3, %cst {dimension_numbers = #tpu.dot_dimension_numbers<[1], [0], [0], [1], [0, 0, 1, 1], [], []>} : vector<8x128xbf16>, vector<128x512xbf16>, vector<8x512xf32> -> vector<8x512xf32>
    %11 = arith.addf %9, %10 : vector<8x512xf32>
    %12 = vector.extract_strided_slice %11 {offsets = [0, 0], sizes = [8, 128], strides = [1, 1]} : vector<8x512xf32> to vector<8x128xf32>
    %13 = arith.negf %12 : vector<8x128xf32>
    %14 = math.exp %13 : vector<8x128xf32>
    %cst_9 = arith.constant 1.000000e+00 : f32
    %15 = vector.broadcast %cst_9 : f32 to vector<8x128xf32>
    %16 = arith.addf %15, %14 : vector<8x128xf32>
    %17 = arith.divf %15, %16 : vector<8x128xf32>
    %18 = vector.extract_strided_slice %11 {offsets = [0, 128], sizes = [8, 128], strides = [1, 1]} : vector<8x512xf32> to vector<8x128xf32>
    %19 = arith.negf %18 : vector<8x128xf32>
    %20 = math.exp %19 : vector<8x128xf32>
    %cst_10 = arith.constant 1.000000e+00 : f32
    %21 = vector.broadcast %cst_10 : f32 to vector<8x128xf32>
    %22 = arith.addf %21, %20 : vector<8x128xf32>
    %23 = arith.divf %21, %22 : vector<8x128xf32>
    %24 = vector.extract_strided_slice %11 {offsets = [0, 256], sizes = [8, 128], strides = [1, 1]} : vector<8x512xf32> to vector<8x128xf32>
    %25 = math.tanh %24 : vector<8x128xf32>
    %26 = vector.extract_strided_slice %11 {offsets = [0, 384], sizes = [8, 128], strides = [1, 1]} : vector<8x512xf32> to vector<8x128xf32>
    %27 = arith.negf %26 : vector<8x128xf32>
    %28 = math.exp %27 : vector<8x128xf32>
    %cst_11 = arith.constant 1.000000e+00 : f32
    %29 = vector.broadcast %cst_11 : f32 to vector<8x128xf32>
    %30 = arith.addf %29, %28 : vector<8x128xf32>
    %31 = arith.divf %29, %30 : vector<8x128xf32>
    %32 = arith.mulf %23, %5 : vector<8x128xf32>
    %33 = arith.mulf %17, %25 : vector<8x128xf32>
    %34 = arith.addf %32, %33 : vector<8x128xf32>
    %35 = math.tanh %34 : vector<8x128xf32>
    %36 = arith.mulf %31, %35 : vector<8x128xf32>
    %37 = arith.truncf %36 : vector<8x128xf32> to vector<8x128xbf16>
    %38 = arith.index_cast %c0_i32_6 : i32 to index
    %c0_12 = arith.constant 0 : index
    %c0_13 = arith.constant 0 : index
    %39 = vector.load %arg4[%38, %c0_12, %c0_13] : memref<8x8x128xbf16, #tpu.memory_space<vmem>>, vector<1x8x128xbf16>
    %40 = vector.shape_cast %39 : vector<1x8x128xbf16> to vector<8x128xbf16>
    %41 = vector.shape_cast %37 : vector<8x128xbf16> to vector<1x8x128xbf16>
    tpu.vector_store %arg4[%38, %c0_12, %c0_13], %41 {strides = array<i32>} : memref<8x8x128xbf16, #tpu.memory_space<vmem>>, vector<1x8x128xbf16>,
    %c1_i32 = arith.constant 1 : i32
    %42 = arith.index_cast %c1_i32 : i32 to index
    %c0_14 = arith.constant 0 : index
    %c0_15 = arith.constant 0 : index
    %43 = vector.load %arg2[%42, %c0_14, %c0_15] : memref<8x8x512xbf16, #tpu.memory_space<vmem>>, vector<1x8x512xbf16>
    %44 = vector.shape_cast %43 : vector<1x8x512xbf16> to vector<8x512xbf16>
    %45 = arith.extf %44 : vector<8x512xbf16> to vector<8x512xf32>
    %cst_16 = arith.constant dense<0.000000e+00> : vector<8x512xf32>
    %46 = tpu.matmul %37, %3, %cst_16 {dimension_numbers = #tpu.dot_dimension_numbers<[1], [0], [0], [1], [0, 0, 1, 1], [], []>} : vector<8x128xbf16>, vector<128x512xbf16>, vector<8x512xf32> -> vector<8x512xf32>
    %47 = arith.addf %45, %46 : vector<8x512xf32>
    %48 = vector.extract_strided_slice %47 {offsets = [0, 0], sizes = [8, 128], strides = [1, 1]} : vector<8x512xf32> to vector<8x128xf32>
    %49 = arith.negf %48 : vector<8x128xf32>
    %50 = math.exp %49 : vector<8x128xf32>
    %cst_17 = arith.constant 1.000000e+00 : f32
    %51 = vector.broadcast %cst_17 : f32 to vector<8x128xf32>
    %52 = arith.addf %51, %50 : vector<8x128xf32>
    %53 = arith.divf %51, %52 : vector<8x128xf32>
    %54 = vector.extract_strided_slice %47 {offsets = [0, 128], sizes = [8, 128], strides = [1, 1]} : vector<8x512xf32> to vector<8x128xf32>
    %55 = arith.negf %54 : vector<8x128xf32>
    %56 = math.exp %55 : vector<8x128xf32>
    %cst_18 = arith.constant 1.000000e+00 : f32
    %57 = vector.broadcast %cst_18 : f32 to vector<8x128xf32>
    %58 = arith.addf %57, %56 : vector<8x128xf32>
    %59 = arith.divf %57, %58 : vector<8x128xf32>
    %60 = vector.extract_strided_slice %47 {offsets = [0, 256], sizes = [8, 128], strides = [1, 1]} : vector<8x512xf32> to vector<8x128xf32>
    %61 = math.tanh %60 : vector<8x128xf32>
    %62 = vector.extract_strided_slice %47 {offsets = [0, 384], sizes = [8, 128], strides = [1, 1]} : vector<8x512xf32> to vector<8x128xf32>
    %63 = arith.negf %62 : vector<8x128xf32>
    %64 = math.exp %63 : vector<8x128xf32>
    %cst_19 = arith.constant 1.000000e+00 : f32
    %65 = vector.broadcast %cst_19 : f32 to vector<8x128xf32>
    %66 = arith.addf %65, %64 : vector<8x128xf32>
    %67 = arith.divf %65, %66 : vector<8x128xf32>
    %68 = arith.mulf %59, %34 : vector<8x128xf32>
    %69 = arith.mulf %53, %61 : vector<8x128xf32>
    %70 = arith.addf %68, %69 : vector<8x128xf32>
    %71 = math.tanh %70 : vector<8x128xf32>
    %72 = arith.mulf %67, %71 : vector<8x128xf32>
    %73 = arith.truncf %72 : vector<8x128xf32> to vector<8x128xbf16>
    %74 = arith.index_cast %c1_i32 : i32 to index
    %c0_20 = arith.constant 0 : index
    %c0_21 = arith.constant 0 : index
    %75 = vector.load %arg4[%74, %c0_20, %c0_21] : memref<8x8x128xbf16, #tpu.memory_space<vmem>>, vector<1x8x128xbf16>
    %76 = vector.shape_cast %75 : vector<1x8x128xbf16> to vector<8x128xbf16>
    %77 = vector.shape_cast %73 : vector<8x128xbf16> to vector<1x8x128xbf16>
    tpu.vector_store %arg4[%74, %c0_20, %c0_21], %77 {strides = array<i32>} : memref<8x8x128xbf16, #tpu.memory_space<vmem>>, vector<1x8x128xbf16>,
    %c2_i32 = arith.constant 2 : i32
    %78 = arith.index_cast %c2_i32 : i32 to index
    %c0_22 = arith.constant 0 : index
    %c0_23 = arith.constant 0 : index
    %79 = vector.load %arg2[%78, %c0_22, %c0_23] : memref<8x8x512xbf16, #tpu.memory_space<vmem>>, vector<1x8x512xbf16>
    %80 = vector.shape_cast %79 : vector<1x8x512xbf16> to vector<8x512xbf16>
    %81 = arith.extf %80 : vector<8x512xbf16> to vector<8x512xf32>
    %cst_24 = arith.constant dense<0.000000e+00> : vector<8x512xf32>
    %82 = tpu.matmul %73, %3, %cst_24 {dimension_numbers = #tpu.dot_dimension_numbers<[1], [0], [0], [1], [0, 0, 1, 1], [], []>} : vector<8x128xbf16>, vector<128x512xbf16>, vector<8x512xf32> -> vector<8x512xf32>
    %83 = arith.addf %81, %82 : vector<8x512xf32>
    %84 = vector.extract_strided_slice %83 {offsets = [0, 0], sizes = [8, 128], strides = [1, 1]} : vector<8x512xf32> to vector<8x128xf32>
    %85 = arith.negf %84 : vector<8x128xf32>
    %86 = math.exp %85 : vector<8x128xf32>
    %cst_25 = arith.constant 1.000000e+00 : f32
    %87 = vector.broadcast %cst_25 : f32 to vector<8x128xf32>
    %88 = arith.addf %87, %86 : vector<8x128xf32>
    %89 = arith.divf %87, %88 : vector<8x128xf32>
    %90 = vector.extract_strided_slice %83 {offsets = [0, 128], sizes = [8, 128], strides = [1, 1]} : vector<8x512xf32> to vector<8x128xf32>
    %91 = arith.negf %90 : vector<8x128xf32>
    %92 = math.exp %91 : vector<8x128xf32>
    %cst_26 = arith.constant 1.000000e+00 : f32
    %93 = vector.broadcast %cst_26 : f32 to vector<8x128xf32>
    %94 = arith.addf %93, %92 : vector<8x128xf32>
    %95 = arith.divf %93, %94 : vector<8x128xf32>
    %96 = vector.extract_strided_slice %83 {offsets = [0, 256], sizes = [8, 128], strides = [1, 1]} : vector<8x512xf32> to vector<8x128xf32>
    %97 = math.tanh %96 : vector<8x128xf32>
    %98 = vector.extract_strided_slice %83 {offsets = [0, 384], sizes = [8, 128], strides = [1, 1]} : vector<8x512xf32> to vector<8x128xf32>
    %99 = arith.negf %98 : vector<8x128xf32>
    %100 = math.exp %99 : vector<8x128xf32>
    %cst_27 = arith.constant 1.000000e+00 : f32
    %101 = vector.broadcast %cst_27 : f32 to vector<8x128xf32>
    %102 = arith.addf %101, %100 : vector<8x128xf32>
    %103 = arith.divf %101, %102 : vector<8x128xf32>
    %104 = arith.mulf %95, %70 : vector<8x128xf32>
    %105 = arith.mulf %89, %97 : vector<8x128xf32>
    %106 = arith.addf %104, %105 : vector<8x128xf32>
    %107 = math.tanh %106 : vector<8x128xf32>
    %108 = arith.mulf %103, %107 : vector<8x128xf32>
    %109 = arith.truncf %108 : vector<8x128xf32> to vector<8x128xbf16>
    %110 = arith.index_cast %c2_i32 : i32 to index
    %c0_28 = arith.constant 0 : index
    %c0_29 = arith.constant 0 : index
    %111 = vector.load %arg4[%110, %c0_28, %c0_29] : memref<8x8x128xbf16, #tpu.memory_space<vmem>>, vector<1x8x128xbf16>
    %112 = vector.shape_cast %111 : vector<1x8x128xbf16> to vector<8x128xbf16>
    %113 = vector.shape_cast %109 : vector<8x128xbf16> to vector<1x8x128xbf16>
    tpu.vector_store %arg4[%110, %c0_28, %c0_29], %113 {strides = array<i32>} : memref<8x8x128xbf16, #tpu.memory_space<vmem>>, vector<1x8x128xbf16>,
    %c3_i32 = arith.constant 3 : i32
    %114 = arith.index_cast %c3_i32 : i32 to index
    %c0_30 = arith.constant 0 : index
    %c0_31 = arith.constant 0 : index
    %115 = vector.load %arg2[%114, %c0_30, %c0_31] : memref<8x8x512xbf16, #tpu.memory_space<vmem>>, vector<1x8x512xbf16>
    %116 = vector.shape_cast %115 : vector<1x8x512xbf16> to vector<8x512xbf16>
    %117 = arith.extf %116 : vector<8x512xbf16> to vector<8x512xf32>
    %cst_32 = arith.constant dense<0.000000e+00> : vector<8x512xf32>
    %118 = tpu.matmul %109, %3, %cst_32 {dimension_numbers = #tpu.dot_dimension_numbers<[1], [0], [0], [1], [0, 0, 1, 1], [], []>} : vector<8x128xbf16>, vector<128x512xbf16>, vector<8x512xf32> -> vector<8x512xf32>
    %119 = arith.addf %117, %118 : vector<8x512xf32>
    %120 = vector.extract_strided_slice %119 {offsets = [0, 0], sizes = [8, 128], strides = [1, 1]} : vector<8x512xf32> to vector<8x128xf32>
    %121 = arith.negf %120 : vector<8x128xf32>
    %122 = math.exp %121 : vector<8x128xf32>
    %cst_33 = arith.constant 1.000000e+00 : f32
    %123 = vector.broadcast %cst_33 : f32 to vector<8x128xf32>
    %124 = arith.addf %123, %122 : vector<8x128xf32>
    %125 = arith.divf %123, %124 : vector<8x128xf32>
    %126 = vector.extract_strided_slice %119 {offsets = [0, 128], sizes = [8, 128], strides = [1, 1]} : vector<8x512xf32> to vector<8x128xf32>
    %127 = arith.negf %126 : vector<8x128xf32>
    %128 = math.exp %127 : vector<8x128xf32>
    %cst_34 = arith.constant 1.000000e+00 : f32
    %129 = vector.broadcast %cst_34 : f32 to vector<8x128xf32>
    %130 = arith.addf %129, %128 : vector<8x128xf32>
    %131 = arith.divf %129, %130 : vector<8x128xf32>
    %132 = vector.extract_strided_slice %119 {offsets = [0, 256], sizes = [8, 128], strides = [1, 1]} : vector<8x512xf32> to vector<8x128xf32>
    %133 = math.tanh %132 : vector<8x128xf32>
    %134 = vector.extract_strided_slice %119 {offsets = [0, 384], sizes = [8, 128], strides = [1, 1]} : vector<8x512xf32> to vector<8x128xf32>
    %135 = arith.negf %134 : vector<8x128xf32>
    %136 = math.exp %135 : vector<8x128xf32>
    %cst_35 = arith.constant 1.000000e+00 : f32
    %137 = vector.broadcast %cst_35 : f32 to vector<8x128xf32>
    %138 = arith.addf %137, %136 : vector<8x128xf32>
    %139 = arith.divf %137, %138 : vector<8x128xf32>
    %140 = arith.mulf %131, %106 : vector<8x128xf32>
    %141 = arith.mulf %125, %133 : vector<8x128xf32>
    %142 = arith.addf %140, %141 : vector<8x128xf32>
    %143 = math.tanh %142 : vector<8x128xf32>
    %144 = arith.mulf %139, %143 : vector<8x128xf32>
    %145 = arith.truncf %144 : vector<8x128xf32> to vector<8x128xbf16>
    %146 = arith.index_cast %c3_i32 : i32 to index
    %c0_36 = arith.constant 0 : index
    %c0_37 = arith.constant 0 : index
    %147 = vector.load %arg4[%146, %c0_36, %c0_37] : memref<8x8x128xbf16, #tpu.memory_space<vmem>>, vector<1x8x128xbf16>
    %148 = vector.shape_cast %147 : vector<1x8x128xbf16> to vector<8x128xbf16>
    %149 = vector.shape_cast %145 : vector<8x128xbf16> to vector<1x8x128xbf16>
    tpu.vector_store %arg4[%146, %c0_36, %c0_37], %149 {strides = array<i32>} : memref<8x8x128xbf16, #tpu.memory_space<vmem>>, vector<1x8x128xbf16>,
    %c4_i32 = arith.constant 4 : i32
    %150 = arith.index_cast %c4_i32 : i32 to index
    %c0_38 = arith.constant 0 : index
    %c0_39 = arith.constant 0 : index
    %151 = vector.load %arg2[%150, %c0_38, %c0_39] : memref<8x8x512xbf16, #tpu.memory_space<vmem>>, vector<1x8x512xbf16>
    %152 = vector.shape_cast %151 : vector<1x8x512xbf16> to vector<8x512xbf16>
    %153 = arith.extf %152 : vector<8x512xbf16> to vector<8x512xf32>
    %cst_40 = arith.constant dense<0.000000e+00> : vector<8x512xf32>
    %154 = tpu.matmul %145, %3, %cst_40 {dimension_numbers = #tpu.dot_dimension_numbers<[1], [0], [0], [1], [0, 0, 1, 1], [], []>} : vector<8x128xbf16>, vector<128x512xbf16>, vector<8x512xf32> -> vector<8x512xf32>
    %155 = arith.addf %153, %154 : vector<8x512xf32>
    %156 = vector.extract_strided_slice %155 {offsets = [0, 0], sizes = [8, 128], strides = [1, 1]} : vector<8x512xf32> to vector<8x128xf32>
    %157 = arith.negf %156 : vector<8x128xf32>
    %158 = math.exp %157 : vector<8x128xf32>
    %cst_41 = arith.constant 1.000000e+00 : f32
    %159 = vector.broadcast %cst_41 : f32 to vector<8x128xf32>
    %160 = arith.addf %159, %158 : vector<8x128xf32>
    %161 = arith.divf %159, %160 : vector<8x128xf32>
    %162 = vector.extract_strided_slice %155 {offsets = [0, 128], sizes = [8, 128], strides = [1, 1]} : vector<8x512xf32> to vector<8x128xf32>
    %163 = arith.negf %162 : vector<8x128xf32>
    %164 = math.exp %163 : vector<8x128xf32>
    %cst_42 = arith.constant 1.000000e+00 : f32
    %165 = vector.broadcast %cst_42 : f32 to vector<8x128xf32>
    %166 = arith.addf %165, %164 : vector<8x128xf32>
    %167 = arith.divf %165, %166 : vector<8x128xf32>
    %168 = vector.extract_strided_slice %155 {offsets = [0, 256], sizes = [8, 128], strides = [1, 1]} : vector<8x512xf32> to vector<8x128xf32>
    %169 = math.tanh %168 : vector<8x128xf32>
    %170 = vector.extract_strided_slice %155 {offsets = [0, 384], sizes = [8, 128], strides = [1, 1]} : vector<8x512xf32> to vector<8x128xf32>
    %171 = arith.negf %170 : vector<8x128xf32>
    %172 = math.exp %171 : vector<8x128xf32>
    %cst_43 = arith.constant 1.000000e+00 : f32
    %173 = vector.broadcast %cst_43 : f32 to vector<8x128xf32>
    %174 = arith.addf %173, %172 : vector<8x128xf32>
    %175 = arith.divf %173, %174 : vector<8x128xf32>
    %176 = arith.mulf %167, %142 : vector<8x128xf32>
    %177 = arith.mulf %161, %169 : vector<8x128xf32>
    %178 = arith.addf %176, %177 : vector<8x128xf32>
    %179 = math.tanh %178 : vector<8x128xf32>
    %180 = arith.mulf %175, %179 : vector<8x128xf32>
    %181 = arith.truncf %180 : vector<8x128xf32> to vector<8x128xbf16>
    %182 = arith.index_cast %c4_i32 : i32 to index
    %c0_44 = arith.constant 0 : index
    %c0_45 = arith.constant 0 : index
    %183 = vector.load %arg4[%182, %c0_44, %c0_45] : memref<8x8x128xbf16, #tpu.memory_space<vmem>>, vector<1x8x128xbf16>
    %184 = vector.shape_cast %183 : vector<1x8x128xbf16> to vector<8x128xbf16>
    %185 = vector.shape_cast %181 : vector<8x128xbf16> to vector<1x8x128xbf16>
    tpu.vector_store %arg4[%182, %c0_44, %c0_45], %185 {strides = array<i32>} : memref<8x8x128xbf16, #tpu.memory_space<vmem>>, vector<1x8x128xbf16>,
    %c5_i32 = arith.constant 5 : i32
    %186 = arith.index_cast %c5_i32 : i32 to index
    %c0_46 = arith.constant 0 : index
    %c0_47 = arith.constant 0 : index
    %187 = vector.load %arg2[%186, %c0_46, %c0_47] : memref<8x8x512xbf16, #tpu.memory_space<vmem>>, vector<1x8x512xbf16>
    %188 = vector.shape_cast %187 : vector<1x8x512xbf16> to vector<8x512xbf16>
    %189 = arith.extf %188 : vector<8x512xbf16> to vector<8x512xf32>
    %cst_48 = arith.constant dense<0.000000e+00> : vector<8x512xf32>
    %190 = tpu.matmul %181, %3, %cst_48 {dimension_numbers = #tpu.dot_dimension_numbers<[1], [0], [0], [1], [0, 0, 1, 1], [], []>} : vector<8x128xbf16>, vector<128x512xbf16>, vector<8x512xf32> -> vector<8x512xf32>
    %191 = arith.addf %189, %190 : vector<8x512xf32>
    %192 = vector.extract_strided_slice %191 {offsets = [0, 0], sizes = [8, 128], strides = [1, 1]} : vector<8x512xf32> to vector<8x128xf32>
    %193 = arith.negf %192 : vector<8x128xf32>
    %194 = math.exp %193 : vector<8x128xf32>
    %cst_49 = arith.constant 1.000000e+00 : f32
    %195 = vector.broadcast %cst_49 : f32 to vector<8x128xf32>
    %196 = arith.addf %195, %194 : vector<8x128xf32>
    %197 = arith.divf %195, %196 : vector<8x128xf32>
    %198 = vector.extract_strided_slice %191 {offsets = [0, 128], sizes = [8, 128], strides = [1, 1]} : vector<8x512xf32> to vector<8x128xf32>
    %199 = arith.negf %198 : vector<8x128xf32>
    %200 = math.exp %199 : vector<8x128xf32>
    %cst_50 = arith.constant 1.000000e+00 : f32
    %201 = vector.broadcast %cst_50 : f32 to vector<8x128xf32>
    %202 = arith.addf %201, %200 : vector<8x128xf32>
    %203 = arith.divf %201, %202 : vector<8x128xf32>
    %204 = vector.extract_strided_slice %191 {offsets = [0, 256], sizes = [8, 128], strides = [1, 1]} : vector<8x512xf32> to vector<8x128xf32>
    %205 = math.tanh %204 : vector<8x128xf32>
    %206 = vector.extract_strided_slice %191 {offsets = [0, 384], sizes = [8, 128], strides = [1, 1]} : vector<8x512xf32> to vector<8x128xf32>
    %207 = arith.negf %206 : vector<8x128xf32>
    %208 = math.exp %207 : vector<8x128xf32>
    %cst_51 = arith.constant 1.000000e+00 : f32
    %209 = vector.broadcast %cst_51 : f32 to vector<8x128xf32>
    %210 = arith.addf %209, %208 : vector<8x128xf32>
    %211 = arith.divf %209, %210 : vector<8x128xf32>
    %212 = arith.mulf %203, %178 : vector<8x128xf32>
    %213 = arith.mulf %197, %205 : vector<8x128xf32>
    %214 = arith.addf %212, %213 : vector<8x128xf32>
    %215 = math.tanh %214 : vector<8x128xf32>
    %216 = arith.mulf %211, %215 : vector<8x128xf32>
    %217 = arith.truncf %216 : vector<8x128xf32> to vector<8x128xbf16>
    %218 = arith.index_cast %c5_i32 : i32 to index
    %c0_52 = arith.constant 0 : index
    %c0_53 = arith.constant 0 : index
    %219 = vector.load %arg4[%218, %c0_52, %c0_53] : memref<8x8x128xbf16, #tpu.memory_space<vmem>>, vector<1x8x128xbf16>
    %220 = vector.shape_cast %219 : vector<1x8x128xbf16> to vector<8x128xbf16>
    %221 = vector.shape_cast %217 : vector<8x128xbf16> to vector<1x8x128xbf16>
    tpu.vector_store %arg4[%218, %c0_52, %c0_53], %221 {strides = array<i32>} : memref<8x8x128xbf16, #tpu.memory_space<vmem>>, vector<1x8x128xbf16>,
    %c6_i32 = arith.constant 6 : i32
    %222 = arith.index_cast %c6_i32 : i32 to index
    %c0_54 = arith.constant 0 : index
    %c0_55 = arith.constant 0 : index
    %223 = vector.load %arg2[%222, %c0_54, %c0_55] : memref<8x8x512xbf16, #tpu.memory_space<vmem>>, vector<1x8x512xbf16>
    %224 = vector.shape_cast %223 : vector<1x8x512xbf16> to vector<8x512xbf16>
    %225 = arith.extf %224 : vector<8x512xbf16> to vector<8x512xf32>
    %cst_56 = arith.constant dense<0.000000e+00> : vector<8x512xf32>
    %226 = tpu.matmul %217, %3, %cst_56 {dimension_numbers = #tpu.dot_dimension_numbers<[1], [0], [0], [1], [0, 0, 1, 1], [], []>} : vector<8x128xbf16>, vector<128x512xbf16>, vector<8x512xf32> -> vector<8x512xf32>
    %227 = arith.addf %225, %226 : vector<8x512xf32>
    %228 = vector.extract_strided_slice %227 {offsets = [0, 0], sizes = [8, 128], strides = [1, 1]} : vector<8x512xf32> to vector<8x128xf32>
    %229 = arith.negf %228 : vector<8x128xf32>
    %230 = math.exp %229 : vector<8x128xf32>
    %cst_57 = arith.constant 1.000000e+00 : f32
    %231 = vector.broadcast %cst_57 : f32 to vector<8x128xf32>
    %232 = arith.addf %231, %230 : vector<8x128xf32>
    %233 = arith.divf %231, %232 : vector<8x128xf32>
    %234 = vector.extract_strided_slice %227 {offsets = [0, 128], sizes = [8, 128], strides = [1, 1]} : vector<8x512xf32> to vector<8x128xf32>
    %235 = arith.negf %234 : vector<8x128xf32>
    %236 = math.exp %235 : vector<8x128xf32>
    %cst_58 = arith.constant 1.000000e+00 : f32
    %237 = vector.broadcast %cst_58 : f32 to vector<8x128xf32>
    %238 = arith.addf %237, %236 : vector<8x128xf32>
    %239 = arith.divf %237, %238 : vector<8x128xf32>
    %240 = vector.extract_strided_slice %227 {offsets = [0, 256], sizes = [8, 128], strides = [1, 1]} : vector<8x512xf32> to vector<8x128xf32>
    %241 = math.tanh %240 : vector<8x128xf32>
    %242 = vector.extract_strided_slice %227 {offsets = [0, 384], sizes = [8, 128], strides = [1, 1]} : vector<8x512xf32> to vector<8x128xf32>
    %243 = arith.negf %242 : vector<8x128xf32>
    %244 = math.exp %243 : vector<8x128xf32>
    %cst_59 = arith.constant 1.000000e+00 : f32
    %245 = vector.broadcast %cst_59 : f32 to vector<8x128xf32>
    %246 = arith.addf %245, %244 : vector<8x128xf32>
    %247 = arith.divf %245, %246 : vector<8x128xf32>
    %248 = arith.mulf %239, %214 : vector<8x128xf32>
    %249 = arith.mulf %233, %241 : vector<8x128xf32>
    %250 = arith.addf %248, %249 : vector<8x128xf32>
    %251 = math.tanh %250 : vector<8x128xf32>
    %252 = arith.mulf %247, %251 : vector<8x128xf32>
    %253 = arith.truncf %252 : vector<8x128xf32> to vector<8x128xbf16>
    %254 = arith.index_cast %c6_i32 : i32 to index
    %c0_60 = arith.constant 0 : index
    %c0_61 = arith.constant 0 : index
    %255 = vector.load %arg4[%254, %c0_60, %c0_61] : memref<8x8x128xbf16, #tpu.memory_space<vmem>>, vector<1x8x128xbf16>
    %256 = vector.shape_cast %255 : vector<1x8x128xbf16> to vector<8x128xbf16>
    %257 = vector.shape_cast %253 : vector<8x128xbf16> to vector<1x8x128xbf16>
    tpu.vector_store %arg4[%254, %c0_60, %c0_61], %257 {strides = array<i32>} : memref<8x8x128xbf16, #tpu.memory_space<vmem>>, vector<1x8x128xbf16>,
    %c7_i32 = arith.constant 7 : i32
    %258 = arith.index_cast %c7_i32 : i32 to index
    %c0_62 = arith.constant 0 : index
    %c0_63 = arith.constant 0 : index
    %259 = vector.load %arg2[%258, %c0_62, %c0_63] : memref<8x8x512xbf16, #tpu.memory_space<vmem>>, vector<1x8x512xbf16>
    %260 = vector.shape_cast %259 : vector<1x8x512xbf16> to vector<8x512xbf16>
    %261 = arith.extf %260 : vector<8x512xbf16> to vector<8x512xf32>
    %cst_64 = arith.constant dense<0.000000e+00> : vector<8x512xf32>
    %262 = tpu.matmul %253, %3, %cst_64 {dimension_numbers = #tpu.dot_dimension_numbers<[1], [0], [0], [1], [0, 0, 1, 1], [], []>} : vector<8x128xbf16>, vector<128x512xbf16>, vector<8x512xf32> -> vector<8x512xf32>
    %263 = arith.addf %261, %262 : vector<8x512xf32>
    %264 = vector.extract_strided_slice %263 {offsets = [0, 0], sizes = [8, 128], strides = [1, 1]} : vector<8x512xf32> to vector<8x128xf32>
    %265 = arith.negf %264 : vector<8x128xf32>
    %266 = math.exp %265 : vector<8x128xf32>
    %cst_65 = arith.constant 1.000000e+00 : f32
    %267 = vector.broadcast %cst_65 : f32 to vector<8x128xf32>
    %268 = arith.addf %267, %266 : vector<8x128xf32>
    %269 = arith.divf %267, %268 : vector<8x128xf32>
    %270 = vector.extract_strided_slice %263 {offsets = [0, 128], sizes = [8, 128], strides = [1, 1]} : vector<8x512xf32> to vector<8x128xf32>
    %271 = arith.negf %270 : vector<8x128xf32>
    %272 = math.exp %271 : vector<8x128xf32>
    %cst_66 = arith.constant 1.000000e+00 : f32
    %273 = vector.broadcast %cst_66 : f32 to vector<8x128xf32>
    %274 = arith.addf %273, %272 : vector<8x128xf32>
    %275 = arith.divf %273, %274 : vector<8x128xf32>
    %276 = vector.extract_strided_slice %263 {offsets = [0, 256], sizes = [8, 128], strides = [1, 1]} : vector<8x512xf32> to vector<8x128xf32>
    %277 = math.tanh %276 : vector<8x128xf32>
    %278 = vector.extract_strided_slice %263 {offsets = [0, 384], sizes = [8, 128], strides = [1, 1]} : vector<8x512xf32> to vector<8x128xf32>
    %279 = arith.negf %278 : vector<8x128xf32>
    %280 = math.exp %279 : vector<8x128xf32>
    %cst_67 = arith.constant 1.000000e+00 : f32
    %281 = vector.broadcast %cst_67 : f32 to vector<8x128xf32>
    %282 = arith.addf %281, %280 : vector<8x128xf32>
    %283 = arith.divf %281, %282 : vector<8x128xf32>
    %284 = arith.mulf %275, %250 : vector<8x128xf32>
    %285 = arith.mulf %269, %277 : vector<8x128xf32>
    %286 = arith.addf %284, %285 : vector<8x128xf32>
    %287 = math.tanh %286 : vector<8x128xf32>
    %288 = arith.mulf %283, %287 : vector<8x128xf32>
    %289 = arith.truncf %288 : vector<8x128xf32> to vector<8x128xbf16>
    %290 = arith.index_cast %c7_i32 : i32 to index
    %c0_68 = arith.constant 0 : index
    %c0_69 = arith.constant 0 : index
    %291 = vector.load %arg4[%290, %c0_68, %c0_69] : memref<8x8x128xbf16, #tpu.memory_space<vmem>>, vector<1x8x128xbf16>
    %292 = vector.shape_cast %291 : vector<1x8x128xbf16> to vector<8x128xbf16>
    %293 = vector.shape_cast %289 : vector<8x128xbf16> to vector<1x8x128xbf16>
    tpu.vector_store %arg4[%290, %c0_68, %c0_69], %293 {strides = array<i32>} : memref<8x8x128xbf16, #tpu.memory_space<vmem>>, vector<1x8x128xbf16>,
    %c8_i32 = arith.constant 8 : i32
    %c0_70 = arith.constant 0 : index
    %c0_71 = arith.constant 0 : index
    %294 = vector.load %arg6[%c0_70, %c0_71] : memref<8x128xbf16, #tpu.memory_space<vmem>>, vector<8x128xbf16>
    tpu.vector_store %arg6[%c0_70, %c0_71], %289 {strides = array<i32>} : memref<8x128xbf16, #tpu.memory_space<vmem>>, vector<8x128xbf16>,
    %c0_72 = arith.constant 0 : index
    %c0_73 = arith.constant 0 : index
    %295 = vector.load %arg7[%c0_72, %c0_73] : memref<8x128xf32, #tpu.memory_space<vmem>>, vector<8x128xf32>
    tpu.vector_store %arg7[%c0_72, %c0_73], %286 {strides = array<i32>} : memref<8x128xf32, #tpu.memory_space<vmem>>, vector<8x128xf32>,
    return
  }
  func.func @transform_0(%arg0: i32, %arg1: i32) -> (i32, i32, i32) {
    %c0_i32 = arith.constant 0 : i32
    %c0_i32_0 = arith.constant 0 : i32
    return %arg1, %arg0, %c0_i32 : i32, i32, i32
  }
  func.func @transform_2(%arg0: i32, %arg1: i32) -> (i32, i32, i32) {
    %c0_i32 = arith.constant 0 : i32
    %c0_i32_0 = arith.constant 0 : i32
    return %arg1, %arg0, %c0_i32 : i32, i32, i32
  }
}

</mosaic_0001>

<bundles_post_ra>
// kernel: lstm_layer_pallas.1
= control target key start
LH: loop header
LB: loop body
LE: loop exit
PB: predicated region body
PF: predicated region fallthrough
CT: control target
= control target key end

     0   :  { %s2096_s0 = inlined_call_operand.vmem [shape: bf16[8,8,512], index: 0, kind: input, shape index: {}]   ;;  %s2097_s1 = inlined_call_operand.vmem [shape: bf16[128,512], index: 1, kind: input, shape index: {}]   ;;  %s2098_s2 = inlined_call_operand.vmem [shape: bf16[8,8,128], index: 2, kind: output, shape index: {}]  }
   0x1   :  { %v1518_v0 = vld [vmem:[%s2097_s1] sm:$0xff]  ;;  %v1523_v1 = vld [vmem:[%s2097_s1 + $0x8] sm:$0xff]  ;;  %v1528_v2 = vld [vmem:[%s2097_s1 + $0x10] sm:$0xff] }
   0x2   :  { %v1533_v3 = vld [vmem:[%s2097_s1 + $0x18] sm:$0xff]  ;;  %v1538_v4 = vld [vmem:[%s2097_s1 + $0x20] sm:$0xff]  ;;  %v1543_v5 = vld [vmem:[%s2097_s1 + $0x28] sm:$0xff] }
   0x3   :  { %v1548_v6 = vld [vmem:[%s2097_s1 + $0x30] sm:$0xff]  ;;  %v1553_v7 = vld [vmem:[%s2097_s1 + $0x38] sm:$0xff]  ;;  %v1558_v8 = vld [vmem:[%s2097_s1 + $0x40] sm:$0xff] }
   0x4   :  { %v1563_v9 = vld [vmem:[%s2097_s1 + $0x48] sm:$0xff]  ;;  %v1568_v10 = vld [vmem:[%s2097_s1 + $0x50] sm:$0xff]  ;;  %v1573_v11 = vld [vmem:[%s2097_s1 + $0x58] sm:$0xff] }
   0x5   :  { %v71_v12 = vld [vmem:[%s2097_s1 + $0x60] sm:$0xff]  ;;  %v1581_v13 = vld [vmem:[%s2097_s1 + $0x68] sm:$0xff]  ;;  %v75_v14 = vld [vmem:[%s2097_s1 + $0x70] sm:$0xff] }
   0x6   :  { %v77_v15 = vld [vmem:[%s2097_s1 + $0x78] sm:$0xff]  ;;  %v79_v16 = vld [vmem:[%s2097_s1 + $0x80] sm:$0xff]  ;;  %v81_v17 = vld [vmem:[%s2097_s1 + $0x88] sm:$0xff] }
   0x7   :  { %v83_v18 = vld [vmem:[%s2097_s1 + $0x90] sm:$0xff]  ;;  %v85_v19 = vld [vmem:[%s2097_s1 + $0x98] sm:$0xff]  ;;  %v87_v20 = vld [vmem:[%s2097_s1 + $0xa0] sm:$0xff] }
   0x8   :  { %v89_v21 = vld [vmem:[%s2097_s1 + $0xa8] sm:$0xff]  ;;  %v91_v22 = vld [vmem:[%s2097_s1 + $0xb0] sm:$0xff]  ;;  %v93_v23 = vld [vmem:[%s2097_s1 + $0xb8] sm:$0xff] }
   0x9   :  { %v95_v24 = vld [vmem:[%s2097_s1 + $0xc0] sm:$0xff]  ;;  %v97_v25 = vld [vmem:[%s2097_s1 + $0xc8] sm:$0xff]  ;;  %v99_v26 = vld [vmem:[%s2097_s1 + $0xd0] sm:$0xff] }
   0xa   :  { %v101_v27 = vld [vmem:[%s2097_s1 + $0xd8] sm:$0xff]  ;;  %v103_v28 = vld [vmem:[%s2097_s1 + $0xe0] sm:$0xff]  ;;  %v105_v29 = vld [vmem:[%s2097_s1 + $0xe8] sm:$0xff] }
   0xb   :  { %v107_v30 = vld [vmem:[%s2097_s1 + $0xf0] sm:$0xff]  ;;  %v109_v31 = vld [vmem:[%s2097_s1 + $0xf8] sm:$0xff] }
   0xc   :  { %118 = vsyncadd [#allocation5], 4096 }
   0xd   :  { %1497 = dma.done.wait [#allocation5], 4096 }
   0xe   :  { %1498 = vsyncadd [#allocation5], 4294963200  ;;  %v1637_v32 = vcombine.high %v103_v28, %v107_v30  ;;  %v1639_v33 = vcombine.low %v103_v28, %v107_v30  ;;  %v1641_v34 = vcombine.high %v95_v24, %v99_v26  ;;  %v1643_v35 = vcombine.high %v105_v29, %v109_v31 }
   0xf   :  { %v1646_v36 = vcombine.low %v105_v29, %v109_v31  ;;  %v1648_v37 = vcombine.high %v97_v25, %v101_v27  ;;  %v1651_v38 = vcombine.low %v95_v24, %v99_v26  ;;  %v1655_v39 = vcombine.high %v87_v20, %v91_v22 }
  0x10   :  { %325 = vmatprep.subr.bf16.mxu0 %v1637_v32  ;;  %366 = vmatprep.subr.bf16.mxu1 %v1643_v35  ;;  %v1658_v40 = vcombine.low %v97_v25, %v101_v27  ;;  %v1499_v41 = vmov 0   ;;  %v1662_v42 = vcombine.high %v89_v21, %v93_v23  ;;  %v1666_v43 = vcombine.low %v87_v20, %v91_v22 }
  0x11   :  { %326 = vmatpush1.bf16.msra.mxu0 %v1639_v33  ;;  %367 = vmatpush1.bf16.msra.mxu1 %v1646_v36  ;;  %123 = vst [vmem:[#allocation3] sm:$0xf] %v1499_v41  ;;  %v1669_v44 = vcombine.high %v79_v16, %v83_v18  ;;  %v1672_v45 = vcombine.low %v89_v21, %v93_v23 }
  0x12   :  { %327 = vmatprep.subr.bf16.mxu0 %v1641_v34  ;;  %368 = vmatprep.subr.bf16.mxu1 %v1648_v37  ;;  %v1675_v46 = vcombine.high %v81_v17, %v85_v19  ;;  %v1679_v47 = vcombine.low %v79_v16, %v83_v18  ;;  %v1682_v48 = vcombine.high %v71_v12, %v75_v14 }
  0x13   :  { %357 = vmatprep.mubr.bf16.mxu0 %v1499_v41  ;;  %398 = vmatprep.mubr.bf16.mxu1 %v1499_v41  ;;  %v1685_v49 = vcombine.low %v81_v17, %v85_v19  ;;  %v1689_v50 = vcombine.high %v1581_v13, %v77_v15  ;;  %v1692_v51 = vcombine.low %v71_v12, %v75_v14  ;;  %v160_v14 = vld [vmem:[%s2096_s0 + $0x8] sm:$0xff] }
  0x14   :  { %v1697_v52 = vcombine.high %v1558_v8, %v1568_v10  ;;  %v1701_v53 = vcombine.low %v1581_v13, %v77_v15  ;;  %v1706_v54 = vcombine.high %v1563_v9, %v1573_v11  ;;  %v1711_v55 = vcombine.low %v1558_v8, %v1568_v10 }
  0x15   :  { %328 = vmatpush1.bf16.msra.mxu0 %v1651_v38  ;;  %369 = vmatpush1.bf16.msra.mxu1 %v1658_v40  ;;  %v1716_v56 = vcombine.high %v1538_v4, %v1548_v6  ;;  %v1721_v57 = vcombine.low %v1563_v9, %v1573_v11  ;;  %v1726_v58 = vcombine.high %v1543_v5, %v1553_v7  ;;  %v164_v18 = vunpack.c.h.bf16 %v160_v14 }
  0x16   :  { %329 = vmatprep.subr.bf16.mxu0 %v1655_v39  ;;  %370 = vmatprep.subr.bf16.mxu1 %v1662_v42  ;;  %v1731_v59 = vcombine.low %v1538_v4, %v1548_v6  ;;  %v1736_v60 = vcombine.high %v1518_v0, %v1528_v2  ;;  %v1741_v61 = vcombine.low %v1543_v5, %v1553_v7  ;;  %v163_v19 = vunpack.c.l.bf16 %v160_v14 }
  0x17   :  { %v1746_v62 = vcombine.high %v1523_v1, %v1533_v3  ;;  %v1751_v63 = vcombine.low %v1518_v0, %v1528_v2  ;;  %v1757_v4 = vcombine.low %v1523_v1, %v1533_v3  ;;  %v159_v0 = vld [vmem:[%s2096_s0] sm:$0xff] }
  0x18   :  { %v157_v5 = vld [vmem:[#allocation3] sm:$0xf]  ;;  %v161_v1 = vunpack.c.l.bf16 %v159_v0  ;;  %v162_v2 = vunpack.c.h.bf16 %v159_v0 }
  0x19   :  { %330 = vmatpush1.bf16.msra.mxu0 %v1666_v43  ;;  %371 = vmatpush1.bf16.msra.mxu1 %v1672_v45 }
  0x1a   :  { %331 = vmatprep.subr.bf16.mxu0 %v1669_v44  ;;  %372 = vmatprep.subr.bf16.mxu1 %v1675_v46 }
  0x1d   :  { %332 = vmatpush1.bf16.msra.mxu0 %v1679_v47  ;;  %373 = vmatpush1.bf16.msra.mxu1 %v1685_v49 }
  0x1e   :  { %333 = vmatprep.subr.bf16.mxu0 %v1682_v48  ;;  %374 = vmatprep.subr.bf16.mxu1 %v1689_v50 }
  0x21   :  { %334 = vmatpush1.bf16.msra.mxu0 %v1692_v51  ;;  %375 = vmatpush1.bf16.msra.mxu1 %v1701_v53 }
  0x22   :  { %335 = vmatprep.subr.bf16.mxu0 %v1697_v52  ;;  %376 = vmatprep.subr.bf16.mxu1 %v1706_v54 }
  0x25   :  { %336 = vmatpush1.bf16.msra.mxu0 %v1711_v55  ;;  %377 = vmatpush1.bf16.msra.mxu1 %v1721_v57 }
  0x26   :  { %337 = vmatprep.subr.bf16.mxu0 %v1716_v56  ;;  %378 = vmatprep.subr.bf16.mxu1 %v1726_v58 }
  0x29   :  { %338 = vmatpush1.bf16.msra.mxu0 %v1731_v59  ;;  %379 = vmatpush1.bf16.msra.mxu1 %v1741_v61 }
  0x2a   :  { %339 = vmatprep.subr.bf16.mxu0 %v1736_v60  ;;  %380 = vmatprep.subr.bf16.mxu1 %v1746_v62 }
  0x2d   :  { %340 = vmatpush1.bf16.msra.mxu0 %v1751_v63  ;;  %381 = vmatpush1.bf16.msra.mxu1 %v1757_v4 }
  0x2e   :  { %444 = vmatprep.subr.bf16.mxu0 %v1637_v32  ;;  %485 = vmatprep.subr.bf16.mxu1 %v1643_v35 }
  0x30   :  { %358 = vmatmul.mubr.bf16.vlgmr.msra.gmra.mxu0 %v157_v5  ;;  %399 = vmatmul.mubr.bf16.vlgmr.msra.gmra.mxu1 %v157_v5 }
  0x31   :  { %445 = vmatpush1.bf16.msra.mxu0 %v1639_v33  ;;  %486 = vmatpush1.bf16.msra.mxu1 %v1646_v36 }
  0x32   :  { %446 = vmatprep.subr.bf16.mxu0 %v1641_v34  ;;  %487 = vmatprep.subr.bf16.mxu1 %v1648_v37 }
  0x33   :  { %476 = vmatprep.mubr.bf16.mxu0 %v1499_v41  ;;  %517 = vmatprep.mubr.bf16.mxu1 %v1499_v41 }
  0x35   :  { %447 = vmatpush1.bf16.msra.mxu0 %v1651_v38  ;;  %488 = vmatpush1.bf16.msra.mxu1 %v1658_v40 }
  0x36   :  { %448 = vmatprep.subr.bf16.mxu0 %v1655_v39  ;;  %489 = vmatprep.subr.bf16.mxu1 %v1662_v42 }
  0x39   :  { %449 = vmatpush1.bf16.msra.mxu0 %v1666_v43  ;;  %490 = vmatpush1.bf16.msra.mxu1 %v1672_v45 }
  0x3a   :  { %450 = vmatprep.subr.bf16.mxu0 %v1669_v44  ;;  %491 = vmatprep.subr.bf16.mxu1 %v1675_v46 }
  0x3d   :  { %451 = vmatpush1.bf16.msra.mxu0 %v1679_v47  ;;  %492 = vmatpush1.bf16.msra.mxu1 %v1685_v49 }
  0x3e   :  { %452 = vmatprep.subr.bf16.mxu0 %v1682_v48  ;;  %493 = vmatprep.subr.bf16.mxu1 %v1689_v50 }
  0x41   :  { %453 = vmatpush1.bf16.msra.mxu0 %v1692_v51  ;;  %494 = vmatpush1.bf16.msra.mxu1 %v1701_v53 }
  0x42   :  { %454 = vmatprep.subr.bf16.mxu0 %v1697_v52  ;;  %495 = vmatprep.subr.bf16.mxu1 %v1706_v54 }
  0x45   :  { %455 = vmatpush1.bf16.msra.mxu0 %v1711_v55  ;;  %496 = vmatpush1.bf16.msra.mxu1 %v1721_v57 }
  0x46   :  { %456 = vmatprep.subr.bf16.mxu0 %v1716_v56  ;;  %497 = vmatprep.subr.bf16.mxu1 %v1726_v58 }
  0x49   :  { %457 = vmatpush1.bf16.msra.mxu0 %v1731_v59  ;;  %498 = vmatpush1.bf16.msra.mxu1 %v1741_v61 }
  0x4a   :  { %458 = vmatprep.subr.bf16.mxu0 %v1736_v60  ;;  %499 = vmatprep.subr.bf16.mxu1 %v1746_v62 }
  0x4d   :  { %459 = vmatpush1.bf16.msra.mxu0 %v1751_v63  ;;  %500 = vmatpush1.bf16.msra.mxu1 %v1757_v4 }
  0x4e   :  { %564 = vmatprep.subr.bf16.mxu0 %v1637_v32  ;;  %605 = vmatprep.subr.bf16.mxu1 %v1643_v35 }
  0xf0   :  { %v359_v3 = vpop.f32.mrf.mxu0  ;;  %v400_v7 = vpop.f32.mrf.mxu1 }
  0xf1   :  { %v407_v6 = vadd.f32 %v359_v3, %v161_v1  ;;  %v409_v21 = vadd.f32 %v400_v7, %v163_v19 }
  0xf2   :  { %v361_v8 = vpop.f32.mrf.mxu0  ;;  %v402_v11 = vpop.f32.mrf.mxu1 }
  0xf3   :  { %v1323_v9 = vmul.f32 -1.442695, %v407_v6  ;;  %v408_v10 = vadd.f32 %v361_v8, %v162_v2  ;;  %v410_v20 = vadd.f32 %v402_v11, %v164_v18  ;;  %v1326_v8 = vld [vmem:[%s2096_s0 + $0x10] sm:$0xff] }
  0xf4   :  { %v363_v12 = vpop.f32.mrf.mxu0  ;;  %v404_v15 = vpop.f32.mrf.mxu1 }
  0xf5   :  { %1369 = vpow2.f32 %v1323_v9  ;;  %v1324_v13 = vmul.f32 -1.442695, %v408_v10  ;;  %v1325_v22 = vmul.f32 -1.442695, %v410_v20  ;;  %v440_v9 = vunpack.c.l.bf16 %v1326_v8 }
  0xf6   :  { %v364_v16 = vpop.f32.mrf.mxu0  ;;  %v405_v17 = vpop.f32.mrf.mxu1  ;;  %v441_v10 = vunpack.c.h.bf16 %v1326_v8 }
  0xf7   :  { %1371 = vpow2.f32 %v1324_v13 }
  0xf8   :  { %1373 = vtanh.f32 %v409_v21 }
  0xf9   :  { %1375 = vpow2.f32 %v1325_v22 }
 0x102   :  { %v1370_v23 = vpop.eup %1369 }
 0x103   :  { %v414_v24 = vadd.f32 1.0, %v1370_v23  ;;  %v1327_v23 = vld [vmem:[%s2096_s0 + $0x18] sm:$0xff] }
 0x104   :  { %v1372_v25 = vpop.eup %1371 }
 0x105   :  { %1377 = vrcp.f32 %v414_v24  ;;  %v420_v26 = vadd.f32 1.0, %v1372_v25  ;;  %v1374_v27 = vpop.eup %1373  ;;  %v443_v24 = vunpack.c.h.bf16 %v1327_v23 }
 0x106   :  { %v1376_v28 = vpop.eup %1375 }
 0x107   :  { %1379 = vrcp.f32 %v420_v26  ;;  %v427_v31 = vadd.f32 1.0, %v1376_v28  ;;  %v442_v26 = vunpack.c.l.bf16 %v1327_v23 }
 0x109   :  { %1381 = vrcp.f32 %v427_v31 }
 0x112   :  { %v1378_v29 = vpop.eup %1377 }
 0x113   :  { %v431_v0 = vmul.f32 %v1378_v29, %v1374_v27 }
 0x114   :  { %v1380_v30 = vpop.eup %1379 }
 0x115   :  { %v430_v5 = vmul.f32 0.0, %v1380_v30 }
 0x116   :  { %v1382_v2 = vpop.eup %1381 }
 0x117   :  { %v1804_v1 = vadd.f32 %v431_v0, %v430_v5 }
 0x119   :  { %1383 = vtanh.f32 %v1804_v1 }
 0x126   :  { %v1384_v3 = vpop.eup %1383 }
 0x127   :  { %v434_v6 = vmul.f32 %v1384_v3, %v1382_v2 }
 0x129   :  { %v435_v7 = vpack.c.bf16 %v434_v6, %v434_v6 }
 0x12b   :  { %436 = vst [vmem:[%s2098_s2] sm:$0xf] %v435_v7  ;;  %477 = vmatmul.mubr.bf16.vlgmr.msra.gmra.mxu0 %v435_v7  ;;  %518 = vmatmul.mubr.bf16.vlgmr.msra.gmra.mxu1 %v435_v7 }
 0x12c   :  { %565 = vmatpush1.bf16.msra.mxu0 %v1639_v33  ;;  %606 = vmatpush1.bf16.msra.mxu1 %v1646_v36 }
 0x12d   :  { %566 = vmatprep.subr.bf16.mxu0 %v1641_v34  ;;  %607 = vmatprep.subr.bf16.mxu1 %v1648_v37 }
 0x12e   :  { %596 = vmatprep.mubr.bf16.mxu0 %v1499_v41  ;;  %637 = vmatprep.mubr.bf16.mxu1 %v1499_v41 }
 0x130   :  { %567 = vmatpush1.bf16.msra.mxu0 %v1651_v38  ;;  %608 = vmatpush1.bf16.msra.mxu1 %v1658_v40 }
 0x131   :  { %568 = vmatprep.subr.bf16.mxu0 %v1655_v39  ;;  %609 = vmatprep.subr.bf16.mxu1 %v1662_v42 }
 0x134   :  { %569 = vmatpush1.bf16.msra.mxu0 %v1666_v43  ;;  %610 = vmatpush1.bf16.msra.mxu1 %v1672_v45 }
 0x135   :  { %570 = vmatprep.subr.bf16.mxu0 %v1669_v44  ;;  %611 = vmatprep.subr.bf16.mxu1 %v1675_v46 }
 0x138   :  { %571 = vmatpush1.bf16.msra.mxu0 %v1679_v47  ;;  %612 = vmatpush1.bf16.msra.mxu1 %v1685_v49 }
 0x139   :  { %572 = vmatprep.subr.bf16.mxu0 %v1682_v48  ;;  %613 = vmatprep.subr.bf16.mxu1 %v1689_v50 }
 0x13c   :  { %573 = vmatpush1.bf16.msra.mxu0 %v1692_v51  ;;  %614 = vmatpush1.bf16.msra.mxu1 %v1701_v53 }
 0x13d   :  { %574 = vmatprep.subr.bf16.mxu0 %v1697_v52  ;;  %615 = vmatprep.subr.bf16.mxu1 %v1706_v54 }
 0x140   :  { %575 = vmatpush1.bf16.msra.mxu0 %v1711_v55  ;;  %616 = vmatpush1.bf16.msra.mxu1 %v1721_v57 }
 0x141   :  { %576 = vmatprep.subr.bf16.mxu0 %v1716_v56  ;;  %617 = vmatprep.subr.bf16.mxu1 %v1726_v58 }
 0x144   :  { %577 = vmatpush1.bf16.msra.mxu0 %v1731_v59  ;;  %618 = vmatpush1.bf16.msra.mxu1 %v1741_v61 }
 0x145   :  { %578 = vmatprep.subr.bf16.mxu0 %v1736_v60  ;;  %619 = vmatprep.subr.bf16.mxu1 %v1746_v62 }
 0x148   :  { %579 = vmatpush1.bf16.msra.mxu0 %v1751_v63  ;;  %620 = vmatpush1.bf16.msra.mxu1 %v1757_v4 }
 0x149   :  { %684 = vmatprep.subr.bf16.mxu0 %v1637_v32  ;;  %725 = vmatprep.subr.bf16.mxu1 %v1643_v35 }
 0x1eb   :  { %v478_v11 = vpop.f32.mrf.mxu0  ;;  %v519_v12 = vpop.f32.mrf.mxu1 }
 0x1ec   :  { %v526_v13 = vadd.f32 %v478_v11, %v440_v9  ;;  %v528_v29 = vadd.f32 %v519_v12, %v442_v26 }
 0x1ed   :  { %v480_v14 = vpop.f32.mrf.mxu0  ;;  %v521_v15 = vpop.f32.mrf.mxu1 }
 0x1ee   :  { %v1328_v16 = vmul.f32 -1.442695, %v526_v13  ;;  %v527_v17 = vadd.f32 %v480_v14, %v441_v10  ;;  %v529_v25 = vadd.f32 %v521_v15, %v443_v24 }
 0x1ef   :  { %v482_v18 = vpop.f32.mrf.mxu0  ;;  %v523_v19 = vpop.f32.mrf.mxu1 }
 0x1f0   :  { %1385 = vpow2.f32 %v1328_v16  ;;  %v1329_v20 = vmul.f32 -1.442695, %v527_v17  ;;  %v1330_v27 = vmul.f32 -1.442695, %v529_v25 }
 0x1f1   :  { %v483_v21 = vpop.f32.mrf.mxu0  ;;  %v524_v22 = vpop.f32.mrf.mxu1 }
 0x1f2   :  { %1387 = vpow2.f32 %v1329_v20 }
 0x1f3   :  { %1389 = vpow2.f32 %v1330_v27 }
 0x1fd   :  { %v1386_v28 = vpop.eup %1385 }
 0x1fe   :  { %v533_v30 = vadd.f32 1.0, %v1386_v28 }
 0x1ff   :  { %v1388_v31 = vpop.eup %1387 }
 0x200   :  { %1391 = vrcp.f32 %v533_v30  ;;  %v539_v5 = vadd.f32 1.0, %v1388_v31  ;;  %v1390_v0 = vpop.eup %1389 }
 0x201   :  { %1393 = vtanh.f32 %v528_v29  ;;  %v546_v7 = vadd.f32 1.0, %v1390_v0  ;;  %v1333_v29 = vld [vmem:[%s2096_s0 + $0x28] sm:$0xff] }
 0x202   :  { %1395 = vrcp.f32 %v539_v5  ;;  %v563_v30 = vunpack.c.h.bf16 %v1333_v29  ;;  %v562_v5 = vunpack.c.l.bf16 %v1333_v29 }
 0x203   :  { %1397 = vrcp.f32 %v546_v7 }
 0x20d   :  { %v1392_v2 = vpop.eup %1391 }
 0x20e   :  { %v1394_v3 = vpop.eup %1393 }
 0x20f   :  { %v1396_v6 = vpop.eup %1395  ;;  %v550_v8 = vmul.f32 %v1394_v3, %v1392_v2 }
 0x210   :  { %v549_v9 = vmul.f32 %v1396_v6, %v1804_v1  ;;  %v1398_v11 = vpop.eup %1397  ;;  %v1332_v1 = vld [vmem:[%s2096_s0 + $0x20] sm:$0xff] }
 0x211   :  { %v560_v15 = vunpack.c.l.bf16 %v1332_v1  ;;  %v561_v16 = vunpack.c.h.bf16 %v1332_v1 }
 0x212   :  { %v1851_v10 = vadd.f32 %v550_v8, %v549_v9 }
 0x214   :  { %1399 = vtanh.f32 %v1851_v10 }
 0x221   :  { %v1400_v12 = vpop.eup %1399 }
 0x222   :  { %v553_v13 = vmul.f32 %v1400_v12, %v1398_v11 }
 0x224   :  { %v554_v14 = vpack.c.bf16 %v553_v13, %v553_v13 }
 0x226   :  { %1331 = vst [vmem:[%s2098_s2 + $0x4] sm:$0xf] %v554_v14  ;;  %597 = vmatmul.mubr.bf16.vlgmr.msra.gmra.mxu0 %v554_v14  ;;  %638 = vmatmul.mubr.bf16.vlgmr.msra.gmra.mxu1 %v554_v14 }
 0x227   :  { %685 = vmatpush1.bf16.msra.mxu0 %v1639_v33  ;;  %726 = vmatpush1.bf16.msra.mxu1 %v1646_v36 }
 0x228   :  { %686 = vmatprep.subr.bf16.mxu0 %v1641_v34  ;;  %727 = vmatprep.subr.bf16.mxu1 %v1648_v37 }
 0x229   :  { %716 = vmatprep.mubr.bf16.mxu0 %v1499_v41  ;;  %757 = vmatprep.mubr.bf16.mxu1 %v1499_v41 }
 0x22b   :  { %687 = vmatpush1.bf16.msra.mxu0 %v1651_v38  ;;  %728 = vmatpush1.bf16.msra.mxu1 %v1658_v40 }
 0x22c   :  { %688 = vmatprep.subr.bf16.mxu0 %v1655_v39  ;;  %729 = vmatprep.subr.bf16.mxu1 %v1662_v42 }
 0x22f   :  { %689 = vmatpush1.bf16.msra.mxu0 %v1666_v43  ;;  %730 = vmatpush1.bf16.msra.mxu1 %v1672_v45 }
 0x230   :  { %690 = vmatprep.subr.bf16.mxu0 %v1669_v44  ;;  %731 = vmatprep.subr.bf16.mxu1 %v1675_v46 }
 0x233   :  { %691 = vmatpush1.bf16.msra.mxu0 %v1679_v47  ;;  %732 = vmatpush1.bf16.msra.mxu1 %v1685_v49 }
 0x234   :  { %692 = vmatprep.subr.bf16.mxu0 %v1682_v48  ;;  %733 = vmatprep.subr.bf16.mxu1 %v1689_v50 }
 0x237   :  { %693 = vmatpush1.bf16.msra.mxu0 %v1692_v51  ;;  %734 = vmatpush1.bf16.msra.mxu1 %v1701_v53 }
 0x238   :  { %694 = vmatprep.subr.bf16.mxu0 %v1697_v52  ;;  %735 = vmatprep.subr.bf16.mxu1 %v1706_v54 }
 0x23b   :  { %695 = vmatpush1.bf16.msra.mxu0 %v1711_v55  ;;  %736 = vmatpush1.bf16.msra.mxu1 %v1721_v57 }
 0x23c   :  { %696 = vmatprep.subr.bf16.mxu0 %v1716_v56  ;;  %737 = vmatprep.subr.bf16.mxu1 %v1726_v58 }
 0x23f   :  { %697 = vmatpush1.bf16.msra.mxu0 %v1731_v59  ;;  %738 = vmatpush1.bf16.msra.mxu1 %v1741_v61 }
 0x240   :  { %698 = vmatprep.subr.bf16.mxu0 %v1736_v60  ;;  %739 = vmatprep.subr.bf16.mxu1 %v1746_v62 }
 0x243   :  { %699 = vmatpush1.bf16.msra.mxu0 %v1751_v63  ;;  %740 = vmatpush1.bf16.msra.mxu1 %v1757_v4 }
 0x244   :  { %804 = vmatprep.subr.bf16.mxu0 %v1637_v32  ;;  %845 = vmatprep.subr.bf16.mxu1 %v1643_v35 }
 0x2e6   :  { %v598_v17 = vpop.f32.mrf.mxu0  ;;  %v639_v18 = vpop.f32.mrf.mxu1 }
 0x2e7   :  { %v646_v19 = vadd.f32 %v598_v17, %v560_v15  ;;  %v648_v3 = vadd.f32 %v639_v18, %v562_v5 }
 0x2e8   :  { %v600_v20 = vpop.f32.mrf.mxu0  ;;  %v641_v21 = vpop.f32.mrf.mxu1 }
 0x2e9   :  { %v1334_v22 = vmul.f32 -1.442695, %v646_v19  ;;  %v647_v23 = vadd.f32 %v600_v20, %v561_v16  ;;  %v649_v31 = vadd.f32 %v641_v21, %v563_v30 }
 0x2ea   :  { %v602_v24 = vpop.f32.mrf.mxu0  ;;  %v643_v25 = vpop.f32.mrf.mxu1 }
 0x2eb   :  { %1401 = vpow2.f32 %v1334_v22  ;;  %v1335_v26 = vmul.f32 -1.442695, %v647_v23  ;;  %v1336_v0 = vmul.f32 -1.442695, %v649_v31 }
 0x2ec   :  { %v603_v27 = vpop.f32.mrf.mxu0  ;;  %v644_v28 = vpop.f32.mrf.mxu1 }
 0x2ed   :  { %1403 = vpow2.f32 %v1335_v26 }
 0x2ee   :  { %1405 = vpow2.f32 %v1336_v0 }
 0x2f8   :  { %v1402_v2 = vpop.eup %1401 }
 0x2f9   :  { %v653_v6 = vadd.f32 1.0, %v1402_v2 }
 0x2fa   :  { %v1404_v7 = vpop.eup %1403 }
 0x2fb   :  { %1407 = vrcp.f32 %v653_v6  ;;  %v659_v8 = vadd.f32 1.0, %v1404_v7  ;;  %v1406_v9 = vpop.eup %1405 }
 0x2fc   :  { %1409 = vtanh.f32 %v648_v3  ;;  %v666_v14 = vadd.f32 1.0, %v1406_v9  ;;  %v1339_v3 = vld [vmem:[%s2096_s0 + $0x38] sm:$0xff] }
 0x2fd   :  { %1411 = vrcp.f32 %v659_v8  ;;  %v683_v6 = vunpack.c.h.bf16 %v1339_v3  ;;  %v682_v8 = vunpack.c.l.bf16 %v1339_v3 }
 0x2fe   :  { %1413 = vrcp.f32 %v666_v14 }
 0x308   :  { %v1408_v11 = vpop.eup %1407 }
 0x309   :  { %v1410_v12 = vpop.eup %1409 }
 0x30a   :  { %v1412_v13 = vpop.eup %1411  ;;  %v670_v1 = vmul.f32 %v1410_v12, %v1408_v11 }
 0x30b   :  { %v669_v15 = vmul.f32 %v1412_v13, %v1851_v10  ;;  %v1414_v17 = vpop.eup %1413  ;;  %v1338_v10 = vld [vmem:[%s2096_s0 + $0x30] sm:$0xff] }
 0x30c   :  { %v680_v21 = vunpack.c.l.bf16 %v1338_v10  ;;  %v681_v22 = vunpack.c.h.bf16 %v1338_v10 }
 0x30d   :  { %v1898_v16 = vadd.f32 %v670_v1, %v669_v15 }
 0x30f   :  { %1415 = vtanh.f32 %v1898_v16 }
 0x31c   :  { %v1416_v18 = vpop.eup %1415 }
 0x31d   :  { %v673_v19 = vmul.f32 %v1416_v18, %v1414_v17 }
 0x31f   :  { %v674_v20 = vpack.c.bf16 %v673_v19, %v673_v19 }
 0x321   :  { %1337 = vst [vmem:[%s2098_s2 + $0x8] sm:$0xf] %v674_v20  ;;  %717 = vmatmul.mubr.bf16.vlgmr.msra.gmra.mxu0 %v674_v20  ;;  %758 = vmatmul.mubr.bf16.vlgmr.msra.gmra.mxu1 %v674_v20 }
 0x322   :  { %805 = vmatpush1.bf16.msra.mxu0 %v1639_v33  ;;  %846 = vmatpush1.bf16.msra.mxu1 %v1646_v36 }
 0x323   :  { %806 = vmatprep.subr.bf16.mxu0 %v1641_v34  ;;  %847 = vmatprep.subr.bf16.mxu1 %v1648_v37 }
 0x324   :  { %836 = vmatprep.mubr.bf16.mxu0 %v1499_v41  ;;  %877 = vmatprep.mubr.bf16.mxu1 %v1499_v41 }
 0x326   :  { %807 = vmatpush1.bf16.msra.mxu0 %v1651_v38  ;;  %848 = vmatpush1.bf16.msra.mxu1 %v1658_v40 }
 0x327   :  { %808 = vmatprep.subr.bf16.mxu0 %v1655_v39  ;;  %849 = vmatprep.subr.bf16.mxu1 %v1662_v42 }
 0x32a   :  { %809 = vmatpush1.bf16.msra.mxu0 %v1666_v43  ;;  %850 = vmatpush1.bf16.msra.mxu1 %v1672_v45 }
 0x32b   :  { %810 = vmatprep.subr.bf16.mxu0 %v1669_v44  ;;  %851 = vmatprep.subr.bf16.mxu1 %v1675_v46 }
 0x32e   :  { %811 = vmatpush1.bf16.msra.mxu0 %v1679_v47  ;;  %852 = vmatpush1.bf16.msra.mxu1 %v1685_v49 }
 0x32f   :  { %812 = vmatprep.subr.bf16.mxu0 %v1682_v48  ;;  %853 = vmatprep.subr.bf16.mxu1 %v1689_v50 }
 0x332   :  { %813 = vmatpush1.bf16.msra.mxu0 %v1692_v51  ;;  %854 = vmatpush1.bf16.msra.mxu1 %v1701_v53 }
 0x333   :  { %814 = vmatprep.subr.bf16.mxu0 %v1697_v52  ;;  %855 = vmatprep.subr.bf16.mxu1 %v1706_v54 }
 0x336   :  { %815 = vmatpush1.bf16.msra.mxu0 %v1711_v55  ;;  %856 = vmatpush1.bf16.msra.mxu1 %v1721_v57 }
 0x337   :  { %816 = vmatprep.subr.bf16.mxu0 %v1716_v56  ;;  %857 = vmatprep.subr.bf16.mxu1 %v1726_v58 }
 0x33a   :  { %817 = vmatpush1.bf16.msra.mxu0 %v1731_v59  ;;  %858 = vmatpush1.bf16.msra.mxu1 %v1741_v61 }
 0x33b   :  { %818 = vmatprep.subr.bf16.mxu0 %v1736_v60  ;;  %859 = vmatprep.subr.bf16.mxu1 %v1746_v62 }
 0x33e   :  { %819 = vmatpush1.bf16.msra.mxu0 %v1751_v63  ;;  %860 = vmatpush1.bf16.msra.mxu1 %v1757_v4 }
 0x33f   :  { %924 = vmatprep.subr.bf16.mxu0 %v1637_v32  ;;  %965 = vmatprep.subr.bf16.mxu1 %v1643_v35 }
 0x3e1   :  { %v718_v23 = vpop.f32.mrf.mxu0  ;;  %v759_v24 = vpop.f32.mrf.mxu1 }
 0x3e2   :  { %v766_v25 = vadd.f32 %v718_v23, %v680_v21  ;;  %v768_v12 = vadd.f32 %v759_v24, %v682_v8 }
 0x3e3   :  { %v720_v26 = vpop.f32.mrf.mxu0  ;;  %v761_v27 = vpop.f32.mrf.mxu1 }
 0x3e4   :  { %v1340_v28 = vmul.f32 -1.442695, %v766_v25  ;;  %v767_v29 = vadd.f32 %v720_v26, %v681_v22  ;;  %v769_v7 = vadd.f32 %v761_v27, %v683_v6 }
 0x3e5   :  { %v722_v30 = vpop.f32.mrf.mxu0  ;;  %v763_v31 = vpop.f32.mrf.mxu1 }
 0x3e6   :  { %1417 = vpow2.f32 %v1340_v28  ;;  %v1341_v5 = vmul.f32 -1.442695, %v767_v29  ;;  %v1342_v9 = vmul.f32 -1.442695, %v769_v7 }
 0x3e7   :  { %v723_v0 = vpop.f32.mrf.mxu0  ;;  %v764_v2 = vpop.f32.mrf.mxu1 }
 0x3e8   :  { %1419 = vpow2.f32 %v1341_v5 }
 0x3e9   :  { %1421 = vpow2.f32 %v1342_v9 }
 0x3f3   :  { %v1418_v11 = vpop.eup %1417 }
 0x3f4   :  { %v773_v13 = vadd.f32 1.0, %v1418_v11 }
 0x3f5   :  { %v1420_v14 = vpop.eup %1419 }
 0x3f6   :  { %1423 = vrcp.f32 %v773_v13  ;;  %v779_v1 = vadd.f32 1.0, %v1420_v14  ;;  %v1422_v15 = vpop.eup %1421 }
 0x3f7   :  { %1425 = vtanh.f32 %v768_v12  ;;  %v786_v20 = vadd.f32 1.0, %v1422_v15  ;;  %v1345_v12 = vld [vmem:[%s2096_s0 + $0x48] sm:$0xff] }
 0x3f8   :  { %1427 = vrcp.f32 %v779_v1  ;;  %v803_v13 = vunpack.c.h.bf16 %v1345_v12  ;;  %v802_v1 = vunpack.c.l.bf16 %v1345_v12 }
 0x3f9   :  { %1429 = vrcp.f32 %v786_v20 }
 0x403   :  { %v1424_v17 = vpop.eup %1423 }
 0x404   :  { %v1426_v18 = vpop.eup %1425 }
 0x405   :  { %v1428_v19 = vpop.eup %1427  ;;  %v790_v10 = vmul.f32 %v1426_v18, %v1424_v17 }
 0x406   :  { %v789_v21 = vmul.f32 %v1428_v19, %v1898_v16  ;;  %v1430_v23 = vpop.eup %1429  ;;  %v1344_v16 = vld [vmem:[%s2096_s0 + $0x40] sm:$0xff] }
 0x407   :  { %v800_v27 = vunpack.c.l.bf16 %v1344_v16  ;;  %v801_v28 = vunpack.c.h.bf16 %v1344_v16 }
 0x408   :  { %v1945_v22 = vadd.f32 %v790_v10, %v789_v21 }
 0x40a   :  { %1431 = vtanh.f32 %v1945_v22 }
 0x417   :  { %v1432_v24 = vpop.eup %1431 }
 0x418   :  { %v793_v25 = vmul.f32 %v1432_v24, %v1430_v23 }
 0x41a   :  { %v794_v26 = vpack.c.bf16 %v793_v25, %v793_v25 }
 0x41c   :  { %1343 = vst [vmem:[%s2098_s2 + $0xc] sm:$0xf] %v794_v26  ;;  %837 = vmatmul.mubr.bf16.vlgmr.msra.gmra.mxu0 %v794_v26  ;;  %878 = vmatmul.mubr.bf16.vlgmr.msra.gmra.mxu1 %v794_v26 }
 0x41d   :  { %925 = vmatpush1.bf16.msra.mxu0 %v1639_v33  ;;  %966 = vmatpush1.bf16.msra.mxu1 %v1646_v36 }
 0x41e   :  { %926 = vmatprep.subr.bf16.mxu0 %v1641_v34  ;;  %967 = vmatprep.subr.bf16.mxu1 %v1648_v37 }
 0x41f   :  { %956 = vmatprep.mubr.bf16.mxu0 %v1499_v41  ;;  %997 = vmatprep.mubr.bf16.mxu1 %v1499_v41 }
 0x421   :  { %927 = vmatpush1.bf16.msra.mxu0 %v1651_v38  ;;  %968 = vmatpush1.bf16.msra.mxu1 %v1658_v40 }
 0x422   :  { %928 = vmatprep.subr.bf16.mxu0 %v1655_v39  ;;  %969 = vmatprep.subr.bf16.mxu1 %v1662_v42 }
 0x425   :  { %929 = vmatpush1.bf16.msra.mxu0 %v1666_v43  ;;  %970 = vmatpush1.bf16.msra.mxu1 %v1672_v45 }
 0x426   :  { %930 = vmatprep.subr.bf16.mxu0 %v1669_v44  ;;  %971 = vmatprep.subr.bf16.mxu1 %v1675_v46 }
 0x429   :  { %931 = vmatpush1.bf16.msra.mxu0 %v1679_v47  ;;  %972 = vmatpush1.bf16.msra.mxu1 %v1685_v49 }
 0x42a   :  { %932 = vmatprep.subr.bf16.mxu0 %v1682_v48  ;;  %973 = vmatprep.subr.bf16.mxu1 %v1689_v50 }
 0x42d   :  { %933 = vmatpush1.bf16.msra.mxu0 %v1692_v51  ;;  %974 = vmatpush1.bf16.msra.mxu1 %v1701_v53 }
 0x42e   :  { %934 = vmatprep.subr.bf16.mxu0 %v1697_v52  ;;  %975 = vmatprep.subr.bf16.mxu1 %v1706_v54 }
 0x431   :  { %935 = vmatpush1.bf16.msra.mxu0 %v1711_v55  ;;  %976 = vmatpush1.bf16.msra.mxu1 %v1721_v57 }
 0x432   :  { %936 = vmatprep.subr.bf16.mxu0 %v1716_v56  ;;  %977 = vmatprep.subr.bf16.mxu1 %v1726_v58 }
 0x435   :  { %937 = vmatpush1.bf16.msra.mxu0 %v1731_v59  ;;  %978 = vmatpush1.bf16.msra.mxu1 %v1741_v61 }
 0x436   :  { %938 = vmatprep.subr.bf16.mxu0 %v1736_v60  ;;  %979 = vmatprep.subr.bf16.mxu1 %v1746_v62 }
 0x439   :  { %939 = vmatpush1.bf16.msra.mxu0 %v1751_v63  ;;  %980 = vmatpush1.bf16.msra.mxu1 %v1757_v4 }
 0x43a   :  { %1044 = vmatprep.subr.bf16.mxu0 %v1637_v32  ;;  %1085 = vmatprep.subr.bf16.mxu1 %v1643_v35 }
 0x4dc   :  { %v838_v29 = vpop.f32.mrf.mxu0  ;;  %v879_v30 = vpop.f32.mrf.mxu1 }
 0x4dd   :  { %v886_v31 = vadd.f32 %v838_v29, %v800_v27  ;;  %v888_v18 = vadd.f32 %v879_v30, %v802_v1 }
 0x4de   :  { %v840_v5 = vpop.f32.mrf.mxu0  ;;  %v881_v0 = vpop.f32.mrf.mxu1 }
 0x4df   :  { %v1346_v2 = vmul.f32 -1.442695, %v886_v31  ;;  %v887_v3 = vadd.f32 %v840_v5, %v801_v28  ;;  %v889_v14 = vadd.f32 %v881_v0, %v803_v13 }
 0x4e0   :  { %v842_v6 = vpop.f32.mrf.mxu0  ;;  %v883_v7 = vpop.f32.mrf.mxu1 }
 0x4e1   :  { %1433 = vpow2.f32 %v1346_v2  ;;  %v1347_v8 = vmul.f32 -1.442695, %v887_v3  ;;  %v1348_v15 = vmul.f32 -1.442695, %v889_v14 }
 0x4e2   :  { %v843_v9 = vpop.f32.mrf.mxu0  ;;  %v884_v11 = vpop.f32.mrf.mxu1 }
 0x4e3   :  { %1435 = vpow2.f32 %v1347_v8 }
 0x4e4   :  { %1437 = vpow2.f32 %v1348_v15 }
 0x4ee   :  { %v1434_v17 = vpop.eup %1433 }
 0x4ef   :  { %v893_v19 = vadd.f32 1.0, %v1434_v17 }
 0x4f0   :  { %v1436_v20 = vpop.eup %1435 }
 0x4f1   :  { %1439 = vrcp.f32 %v893_v19  ;;  %v899_v10 = vadd.f32 1.0, %v1436_v20  ;;  %v1438_v21 = vpop.eup %1437 }
 0x4f2   :  { %1441 = vtanh.f32 %v888_v18  ;;  %v906_v26 = vadd.f32 1.0, %v1438_v21 }
 0x4f3   :  { %1443 = vrcp.f32 %v899_v10 }
 0x4f4   :  { %1445 = vrcp.f32 %v906_v26 }
 0x4fe   :  { %v1440_v23 = vpop.eup %1439 }
 0x4ff   :  { %v1442_v24 = vpop.eup %1441 }
 0x500   :  { %v1444_v25 = vpop.eup %1443  ;;  %v910_v16 = vmul.f32 %v1442_v24, %v1440_v23 }
 0x501   :  { %v909_v27 = vmul.f32 %v1444_v25, %v1945_v22  ;;  %v1446_v29 = vpop.eup %1445  ;;  %v1350_v22 = vld [vmem:[%s2096_s0 + $0x50] sm:$0xff] }
 0x502   :  { %v920_v0 = vunpack.c.l.bf16 %v1350_v22  ;;  %v921_v2 = vunpack.c.h.bf16 %v1350_v22 }
 0x503   :  { %v1992_v28 = vadd.f32 %v910_v16, %v909_v27 }
 0x505   :  { %1447 = vtanh.f32 %v1992_v28 }
 0x512   :  { %v1448_v30 = vpop.eup %1447 }
 0x513   :  { %v913_v31 = vmul.f32 %v1448_v30, %v1446_v29 }
 0x515   :  { %v914_v5 = vpack.c.bf16 %v913_v31, %v913_v31 }
 0x517   :  { %1349 = vst [vmem:[%s2098_s2 + $0x10] sm:$0xf] %v914_v5  ;;  %957 = vmatmul.mubr.bf16.vlgmr.msra.gmra.mxu0 %v914_v5  ;;  %998 = vmatmul.mubr.bf16.vlgmr.msra.gmra.mxu1 %v914_v5 }
 0x518   :  { %1045 = vmatpush1.bf16.msra.mxu0 %v1639_v33  ;;  %1086 = vmatpush1.bf16.msra.mxu1 %v1646_v36 }
 0x519   :  { %1046 = vmatprep.subr.bf16.mxu0 %v1641_v34  ;;  %1087 = vmatprep.subr.bf16.mxu1 %v1648_v37 }
 0x51a   :  { %1076 = vmatprep.mubr.bf16.mxu0 %v1499_v41  ;;  %1117 = vmatprep.mubr.bf16.mxu1 %v1499_v41 }
 0x51c   :  { %1047 = vmatpush1.bf16.msra.mxu0 %v1651_v38  ;;  %1088 = vmatpush1.bf16.msra.mxu1 %v1658_v40 }
 0x51d   :  { %1048 = vmatprep.subr.bf16.mxu0 %v1655_v39  ;;  %1089 = vmatprep.subr.bf16.mxu1 %v1662_v42 }
 0x520   :  { %1049 = vmatpush1.bf16.msra.mxu0 %v1666_v43  ;;  %1090 = vmatpush1.bf16.msra.mxu1 %v1672_v45 }
 0x521   :  { %1050 = vmatprep.subr.bf16.mxu0 %v1669_v44  ;;  %1091 = vmatprep.subr.bf16.mxu1 %v1675_v46 }
 0x524   :  { %1051 = vmatpush1.bf16.msra.mxu0 %v1679_v47  ;;  %1092 = vmatpush1.bf16.msra.mxu1 %v1685_v49 }
 0x525   :  { %1052 = vmatprep.subr.bf16.mxu0 %v1682_v48  ;;  %1093 = vmatprep.subr.bf16.mxu1 %v1689_v50 }
 0x528   :  { %1053 = vmatpush1.bf16.msra.mxu0 %v1692_v51  ;;  %1094 = vmatpush1.bf16.msra.mxu1 %v1701_v53 }
 0x529   :  { %1054 = vmatprep.subr.bf16.mxu0 %v1697_v52  ;;  %1095 = vmatprep.subr.bf16.mxu1 %v1706_v54 }
 0x52c   :  { %1055 = vmatpush1.bf16.msra.mxu0 %v1711_v55  ;;  %1096 = vmatpush1.bf16.msra.mxu1 %v1721_v57 }
 0x52d   :  { %1056 = vmatprep.subr.bf16.mxu0 %v1716_v56  ;;  %1097 = vmatprep.subr.bf16.mxu1 %v1726_v58 }
 0x530   :  { %1057 = vmatpush1.bf16.msra.mxu0 %v1731_v59  ;;  %1098 = vmatpush1.bf16.msra.mxu1 %v1741_v61 }
 0x531   :  { %1058 = vmatprep.subr.bf16.mxu0 %v1736_v60  ;;  %1099 = vmatprep.subr.bf16.mxu1 %v1746_v62 }
 0x534   :  { %1059 = vmatpush1.bf16.msra.mxu0 %v1751_v63  ;;  %1100 = vmatpush1.bf16.msra.mxu1 %v1757_v4 }
 0x535   :  { %1164 = vmatprep.subr.bf16.mxu0 %v1637_v32  ;;  %1205 = vmatprep.subr.bf16.mxu1 %v1643_v35  ;;  %v1351_v35 = vld [vmem:[%s2096_s0 + $0x58] sm:$0xff] }
 0x536   :  { %v923_v17 = vunpack.c.h.bf16 %v1351_v35  ;;  %v922_v19 = vunpack.c.l.bf16 %v1351_v35 }
 0x5d7   :  { %v958_v3 = vpop.f32.mrf.mxu0  ;;  %v999_v6 = vpop.f32.mrf.mxu1 }
 0x5d8   :  { %v1006_v7 = vadd.f32 %v958_v3, %v920_v0  ;;  %v1008_v21 = vadd.f32 %v999_v6, %v922_v19 }
 0x5d9   :  { %v960_v8 = vpop.f32.mrf.mxu0  ;;  %v1001_v9 = vpop.f32.mrf.mxu1 }
 0x5da   :  { %v1352_v11 = vmul.f32 -1.442695, %v1006_v7  ;;  %v1007_v12 = vadd.f32 %v960_v8, %v921_v2  ;;  %v1009_v18 = vadd.f32 %v1001_v9, %v923_v17 }
 0x5db   :  { %v962_v13 = vpop.f32.mrf.mxu0  ;;  %v1003_v14 = vpop.f32.mrf.mxu1 }
 0x5dc   :  { %1449 = vpow2.f32 %v1352_v11  ;;  %v1353_v1 = vmul.f32 -1.442695, %v1007_v12  ;;  %v1354_v20 = vmul.f32 -1.442695, %v1009_v18  ;;  %v1362_v13 = vld [vmem:[%s2096_s0 + $0x70] sm:$0xff] }
 0x5dd   :  { %v963_v32 = vpop.f32.mrf.mxu0  ;;  %v1004_v15 = vpop.f32.mrf.mxu1  ;;  %v1160_v14 = vunpack.c.l.bf16 %v1362_v13 }
 0x5de   :  { %1451 = vpow2.f32 %v1353_v1  ;;  %v1161_v1 = vunpack.c.h.bf16 %v1362_v13 }
 0x5df   :  { %1453 = vpow2.f32 %v1354_v20 }
 0x5e9   :  { %v1450_v10 = vpop.eup %1449 }
 0x5ea   :  { %v1013_v23 = vadd.f32 1.0, %v1450_v10 }
 0x5eb   :  { %v1452_v24 = vpop.eup %1451 }
 0x5ec   :  { %1455 = vrcp.f32 %v1013_v23  ;;  %v1019_v25 = vadd.f32 1.0, %v1452_v24  ;;  %v1454_v26 = vpop.eup %1453 }
 0x5ed   :  { %1457 = vtanh.f32 %v1008_v21  ;;  %v1026_v30 = vadd.f32 1.0, %v1454_v26  ;;  %v1363_v26 = vld [vmem:[%s2096_s0 + $0x78] sm:$0xff] }
 0x5ee   :  { %1459 = vrcp.f32 %v1019_v25 }
 0x5ef   :  { %1461 = vrcp.f32 %v1026_v30 }
 0x5f9   :  { %v1456_v16 = vpop.eup %1455 }
 0x5fa   :  { %v1458_v27 = vpop.eup %1457 }
 0x5fb   :  { %v1460_v29 = vpop.eup %1459  ;;  %v1030_v31 = vmul.f32 %v1458_v27, %v1456_v16  ;;  %v1163_v16 = vunpack.c.h.bf16 %v1363_v26 }
 0x5fc   :  { %v1029_v5 = vmul.f32 %v1460_v29, %v1992_v28  ;;  %v1462_v0 = vpop.eup %1461  ;;  %v1162_v29 = vunpack.c.l.bf16 %v1363_v26 }
 0x5fe   :  { %v2039_v22 = vadd.f32 %v1030_v31, %v1029_v5 }
 0x600   :  { %1463 = vtanh.f32 %v2039_v22 }
 0x60d   :  { %v1464_v2 = vpop.eup %1463 }
 0x60e   :  { %v1033_v3 = vmul.f32 %v1464_v2, %v1462_v0 }
 0x610   :  { %v1034_v6 = vpack.c.bf16 %v1033_v3, %v1033_v3 }
 0x612   :  { %1355 = vst [vmem:[%s2098_s2 + $0x14] sm:$0xf] %v1034_v6  ;;  %1077 = vmatmul.mubr.bf16.vlgmr.msra.gmra.mxu0 %v1034_v6  ;;  %1118 = vmatmul.mubr.bf16.vlgmr.msra.gmra.mxu1 %v1034_v6 }
 0x613   :  { %1165 = vmatpush1.bf16.msra.mxu0 %v1639_v33  ;;  %1206 = vmatpush1.bf16.msra.mxu1 %v1646_v36  ;;  %v1356_v33 = vld [vmem:[%s2096_s0 + $0x60] sm:$0xff] }
 0x614   :  { %1166 = vmatprep.subr.bf16.mxu0 %v1641_v34  ;;  %1207 = vmatprep.subr.bf16.mxu1 %v1648_v37  ;;  %v1040_v34 = vunpack.c.l.bf16 %v1356_v33  ;;  %v1041_v36 = vunpack.c.h.bf16 %v1356_v33 }
 0x615   :  { %1196 = vmatprep.mubr.bf16.mxu0 %v1499_v41  ;;  %1237 = vmatprep.mubr.bf16.mxu1 %v1499_v41 }
 0x617   :  { %1167 = vmatpush1.bf16.msra.mxu0 %v1651_v38  ;;  %1208 = vmatpush1.bf16.msra.mxu1 %v1658_v40 }
 0x618   :  { %1168 = vmatprep.subr.bf16.mxu0 %v1655_v39  ;;  %1209 = vmatprep.subr.bf16.mxu1 %v1662_v42 }
 0x61b   :  { %1169 = vmatpush1.bf16.msra.mxu0 %v1666_v43  ;;  %1210 = vmatpush1.bf16.msra.mxu1 %v1672_v45 }
 0x61c   :  { %1170 = vmatprep.subr.bf16.mxu0 %v1669_v44  ;;  %1211 = vmatprep.subr.bf16.mxu1 %v1675_v46 }
 0x61f   :  { %1171 = vmatpush1.bf16.msra.mxu0 %v1679_v47  ;;  %1212 = vmatpush1.bf16.msra.mxu1 %v1685_v49  ;;  %v1357_v49 = vld [vmem:[%s2096_s0 + $0x68] sm:$0xff] }
 0x620   :  { %1172 = vmatprep.subr.bf16.mxu0 %v1682_v48  ;;  %1213 = vmatprep.subr.bf16.mxu1 %v1689_v50  ;;  %v1043_v50 = vunpack.c.h.bf16 %v1357_v49 }
 0x623   :  { %1173 = vmatpush1.bf16.msra.mxu0 %v1692_v51  ;;  %1214 = vmatpush1.bf16.msra.mxu1 %v1701_v53 }
 0x624   :  { %1174 = vmatprep.subr.bf16.mxu0 %v1697_v52  ;;  %1215 = vmatprep.subr.bf16.mxu1 %v1706_v54  ;;  %v1042_v52 = vunpack.c.l.bf16 %v1357_v49 }
 0x627   :  { %1175 = vmatpush1.bf16.msra.mxu0 %v1711_v55  ;;  %1216 = vmatpush1.bf16.msra.mxu1 %v1721_v57 }
 0x628   :  { %1176 = vmatprep.subr.bf16.mxu0 %v1716_v56  ;;  %1217 = vmatprep.subr.bf16.mxu1 %v1726_v58 }
 0x62b   :  { %1177 = vmatpush1.bf16.msra.mxu0 %v1731_v59  ;;  %1218 = vmatpush1.bf16.msra.mxu1 %v1741_v61 }
 0x62c   :  { %1178 = vmatprep.subr.bf16.mxu0 %v1736_v60  ;;  %1219 = vmatprep.subr.bf16.mxu1 %v1746_v62 }
 0x62f   :  { %1179 = vmatpush1.bf16.msra.mxu0 %v1751_v63  ;;  %1220 = vmatpush1.bf16.msra.mxu1 %v1757_v4 }
 0x6d2   :  { %v1078_v37 = vpop.f32.mrf.mxu0  ;;  %v1119_v38 = vpop.f32.mrf.mxu1 }
 0x6d3   :  { %v1126_v39 = vadd.f32 %v1078_v37, %v1040_v34  ;;  %v1128_v55 = vadd.f32 %v1119_v38, %v1042_v52 }
 0x6d4   :  { %v1080_v40 = vpop.f32.mrf.mxu0  ;;  %v1121_v41 = vpop.f32.mrf.mxu1 }
 0x6d5   :  { %v1358_v42 = vmul.f32 -1.442695, %v1126_v39  ;;  %v1127_v43 = vadd.f32 %v1080_v40, %v1041_v36  ;;  %v1129_v51 = vadd.f32 %v1121_v41, %v1043_v50 }
 0x6d6   :  { %v1082_v44 = vpop.f32.mrf.mxu0  ;;  %v1123_v45 = vpop.f32.mrf.mxu1 }
 0x6d7   :  { %1465 = vpow2.f32 %v1358_v42  ;;  %v1359_v46 = vmul.f32 -1.442695, %v1127_v43  ;;  %v1360_v53 = vmul.f32 -1.442695, %v1129_v51 }
 0x6d8   :  { %v1083_v47 = vpop.f32.mrf.mxu0  ;;  %v1124_v48 = vpop.f32.mrf.mxu1 }
 0x6d9   :  { %1467 = vpow2.f32 %v1359_v46 }
 0x6da   :  { %1469 = vpow2.f32 %v1360_v53 }
 0x6e4   :  { %v1466_v54 = vpop.eup %1465 }
 0x6e5   :  { %v1133_v56 = vadd.f32 1.0, %v1466_v54 }
 0x6e6   :  { %v1468_v57 = vpop.eup %1467 }
 0x6e7   :  { %1471 = vrcp.f32 %v1133_v56  ;;  %v1139_v58 = vadd.f32 1.0, %v1468_v57  ;;  %v1470_v59 = vpop.eup %1469 }
 0x6e8   :  { %1473 = vtanh.f32 %v1128_v55  ;;  %v1146_v63 = vadd.f32 1.0, %v1470_v59 }
 0x6e9   :  { %1475 = vrcp.f32 %v1139_v58 }
 0x6ea   :  { %1477 = vrcp.f32 %v1146_v63 }
 0x6f4   :  { %v1472_v60 = vpop.eup %1471 }
 0x6f5   :  { %v1474_v61 = vpop.eup %1473 }
 0x6f6   :  { %v1476_v62 = vpop.eup %1475  ;;  %v1150_v4 = vmul.f32 %v1474_v61, %v1472_v60 }
 0x6f7   :  { %v1149_v28 = vmul.f32 %v1476_v62, %v2039_v22  ;;  %v1478_v8 = vpop.eup %1477 }
 0x6f9   :  { %v1151_v7 = vadd.f32 %v1150_v4, %v1149_v28 }
 0x6fb   :  { %1479 = vtanh.f32 %v1151_v7 }
 0x708   :  { %v1480_v9 = vpop.eup %1479 }
 0x709   :  { %v1153_v11 = vmul.f32 %v1480_v9, %v1478_v8 }
 0x70b   :  { %v1154_v12 = vpack.c.bf16 %v1153_v11, %v1153_v11 }
 0x70d   :  { %1361 = vst [vmem:[%s2098_s2 + $0x18] sm:$0xf] %v1154_v12  ;;  %1197 = vmatmul.mubr.bf16.vlgmr.msra.gmra.mxu0 %v1154_v12  ;;  %1238 = vmatmul.mubr.bf16.vlgmr.msra.gmra.mxu1 %v1154_v12 }
 0x7cd   :  { %v1198_v32 = vpop.f32.mrf.mxu0  ;;  %v1239_v15 = vpop.f32.mrf.mxu1 }
 0x7ce   :  { %v1246_v35 = vadd.f32 %v1198_v32, %v1160_v14  ;;  %v1248_v5 = vadd.f32 %v1239_v15, %v1162_v29 }
 0x7cf   :  { %v1200_v17 = vpop.f32.mrf.mxu0  ;;  %v1241_v18 = vpop.f32.mrf.mxu1 }
 0x7d0   :  { %v1364_v19 = vmul.f32 -1.442695, %v1246_v35  ;;  %v1247_v20 = vadd.f32 %v1200_v17, %v1161_v1  ;;  %v1249_v27 = vadd.f32 %v1241_v18, %v1163_v16 }
 0x7d1   :  { %v1202_v10 = vpop.f32.mrf.mxu0  ;;  %v1243_v21 = vpop.f32.mrf.mxu1 }
 0x7d2   :  { %1481 = vpow2.f32 %v1364_v19  ;;  %v1365_v23 = vmul.f32 -1.442695, %v1247_v20  ;;  %v1366_v30 = vmul.f32 -1.442695, %v1249_v27 }
 0x7d3   :  { %v1203_v24 = vpop.f32.mrf.mxu0  ;;  %v1244_v25 = vpop.f32.mrf.mxu1 }
 0x7d4   :  { %1483 = vpow2.f32 %v1365_v23 }
 0x7d5   :  { %1485 = vpow2.f32 %v1366_v30 }
 0x7df   :  { %v1482_v31 = vpop.eup %1481 }
 0x7e0   :  { %v1253_v22 = vadd.f32 1.0, %v1482_v31 }
 0x7e1   :  { %v1484_v0 = vpop.eup %1483 }
 0x7e2   :  { %1487 = vrcp.f32 %v1253_v22  ;;  %v1259_v2 = vadd.f32 1.0, %v1484_v0  ;;  %v1486_v3 = vpop.eup %1485 }
 0x7e3   :  { %1489 = vtanh.f32 %v1248_v5  ;;  %v1266_v36 = vadd.f32 1.0, %v1486_v3 }
 0x7e4   :  { %1491 = vrcp.f32 %v1259_v2 }
 0x7e5   :  { %1493 = vrcp.f32 %v1266_v36 }
 0x7ef   :  { %v1488_v6 = vpop.eup %1487 }
 0x7f0   :  { %v1490_v33 = vpop.eup %1489 }
 0x7f1   :  { %v1492_v34 = vpop.eup %1491  ;;  %v1270_v37 = vmul.f32 %v1490_v33, %v1488_v6 }
 0x7f2   :  { %v1269_v38 = vmul.f32 %v1492_v34, %v1151_v7  ;;  %v1494_v40 = vpop.eup %1493 }
 0x7f4   :  { %v1271_v39 = vadd.f32 %v1270_v37, %v1269_v38 }
 0x7f6   :  { %1495 = vtanh.f32 %v1271_v39 }
 0x803   :  { %v1496_v41 = vpop.eup %1495 }
 0x804   :  { %v1273_v42 = vmul.f32 %v1496_v41, %v1494_v40 }
 0x806   :  { %v1274_v43 = vpack.c.bf16 %v1273_v42, %v1273_v42 }
 0x808   :  { %1367 = vst [vmem:[%s2098_s2 + $0x1c] sm:$0xf] %v1274_v43  ;;  %1277 = vst [vmem:[#allocation3] sm:$0xf] %v1274_v43 }

</bundles_post_ra>
